<compile_context>
chip_gen: v6e
topology: v6e:2x2x1
jax: 0.10.0
libtpu: 0.0.40
codegen_flags: <defaults>
</compile_context>

<pallas_src>
import jax
import jax.numpy as jnp
from jax import lax
from jax.experimental import pallas as pl
from jax.experimental.pallas import tpu as pltpu


def _crf_viterbi_kernel(em_ref, trans_t_ref, out_ref, hist_ref, trans_b_ref):
    # em_ref:      (S, T, Bb)       f32  time-major emissions, batch on lanes
    # trans_t_ref: (T, T)           f32  transposed transitions [j,i]=trans[i,j]
    # out_ref:     (n_tiles, 8, Bb) i32  decoded tags, 8 timesteps per tile
    # hist_ref:    (S, T, Bb)       i32  scratch: backpointers (rows 1..S-1)
    # trans_b_ref: (T, T, Bb)       f32  scratch: lane-broadcast trans columns
    S, T, Bb = em_ref.shape
    n_tiles = out_ref.shape[0]

    def tree_max_argmax(leaves):
        # leaves: [(val, idx), ...] ordered by tag index.  Returns (max, argmax)
        # with lowest-index tie-breaking (matches jnp.argmax / first max).
        nodes = list(leaves)
        p = 1
        while p < len(nodes):
            p *= 2
        nodes = nodes + [nodes[0]] * (p - len(nodes))  # value/idx pair stays valid
        while len(nodes) > 1:
            nxt = []
            for j in range(0, len(nodes), 2):
                lv, li = nodes[j]
                rv, ri = nodes[j + 1]
                take_r = rv > lv                       # strict: lower index wins ties
                nxt.append((jnp.maximum(lv, rv), jnp.where(take_r, ri, li)))
            nodes = nxt
        return nodes[0]

    def mux_gather(hist_t, sel):
        # hist_t: (T, Bb) i32; sel: (1, Bb) i32 in [0, T).  Returns (1, Bb):
        # hist_t[sel[b], b] via a log-depth multiplexer on the bits of sel.
        rows = [hist_t[i:i + 1, :] for i in range(T)]
        p = 1
        while p < len(rows):
            p *= 2
        rows = rows + [rows[0]] * (p - len(rows))      # sel < T -> never selected
        bit = 0
        while len(rows) > 1:
            take_hi = ((sel >> bit) & 1) == 1
            rows = [jnp.where(take_hi, rows[j + 1], rows[j])
                    for j in range(0, len(rows), 2)]
            bit += 1
        return rows[0]

    # Stage lane-broadcast transition columns in VMEM once per batch block
    # (keeps the register file free; trans_b_ref[i][j, b] == transitions[i, j]).
    trans_t = trans_t_ref[...]
    for i in range(T):
        trans_b_ref[i] = jnp.broadcast_to(trans_t[:, i:i + 1], (T, Bb))

    # ---------------- forward (max-product) pass ----------------
    score0 = em_ref[0].astype(jnp.float32)             # (T, Bb)

    def fwd_step(t, score):
        cands = [(score[i:i + 1, :] + trans_b_ref[i], jnp.int32(i))
                 for i in range(T)]
        best_val, best_idx = tree_max_argmax(cands)     # (T, Bb), (T, Bb)
        hist_ref[t] = best_idx                          # off the critical chain
        return best_val + em_ref[t]

    fwd_unroll = max(1, min(8, S - 1))
    score = lax.fori_loop(1, S, fwd_step, score0, unroll=fwd_unroll)

    # ---------------- argmax over tags of the final score ----------------
    _, best0 = tree_max_argmax(
        [(score[i:i + 1, :], jnp.int32(i)) for i in range(T)])  # (1, Bb) i32

    # ---------------- backtrack, staged as dense (8, Bb) tiles ----------------
    row_iota = lax.broadcasted_iota(jnp.int32, (8, Bb), 0)

    def assemble(rows):
        tile = jnp.zeros((8, Bb), jnp.int32)
        for r, row in enumerate(rows):
            if row is not None:
                tile = jnp.where(row_iota == r, row, tile)
        return tile

    # Top (possibly partial) tile handled with static row logic so the full
    # tiles below need no per-row bound checks on the carry chain.
    top = n_tiles - 1
    carry = best0
    rows = [None] * 8
    for r in range(7, -1, -1):
        t = top * 8 + r                                 # static Python int
        if t > S - 1:
            continue                                    # padding row, stays 0
        if t == S - 1:
            rows[r] = best0
            carry = best0
        else:
            carry = mux_gather(hist_ref[t + 1], carry)
            rows[r] = carry
    out_ref[top] = assemble(rows)

    # Remaining full tiles, highest to lowest; every row t has t + 1 <= S - 1.
    def back_tile(i, carry):
        k = top - 1 - i
        rows = [None] * 8
        for r in range(7, -1, -1):
            carry = mux_gather(hist_ref[k * 8 + r + 1], carry)
            rows[r] = carry
        out_ref[k] = assemble(rows)
        return carry

    if n_tiles > 1:
        lax.fori_loop(0, n_tiles - 1, back_tile, carry)


def crf_decode(emissions, transitions):
    """emissions: (B, S, T) float32; transitions: (T, T) float32 -> (B, S) int32."""
    B, S, T = emissions.shape
    bblk = B if B < 128 else 128
    n_blocks = pl.cdiv(B, bblk)          # partial edge block allowed (no pad pass)
    n_tiles = pl.cdiv(S, 8)

    # TODO(synk): fold this relayout into the producer (accept time-major
    # emissions) to save one extra HBM pass over emissions (matters most on v5e).
    em = jnp.transpose(emissions, (1, 2, 0)).astype(jnp.float32)   # (S, T, B)
    trans_t = jnp.transpose(transitions).astype(jnp.float32)       # [j,i]=trans[i,j]

    def rup(x, m):
        return ((x + m - 1) // m) * m

    # VMEM budget (padded to (8,128) tiles): double-buffered emissions block,
    # backpointer + broadcast-transition scratch, double-buffered output block.
    lane = rup(bblk, 128)
    sub_t = rup(T, 8)
    em_blk = S * sub_t * lane * 4
    hist_blk = S * sub_t * lane * 4      # TODO(synk): int8 / bit-packed backpointers for T >= 32
    trans_b_blk = T * sub_t * lane * 4
    out_blk = n_tiles * 8 * lane * 4
    trans_in = sub_t * rup(T, 128) * 4
    need = 2 * em_blk + hist_blk + trans_b_blk + 2 * out_blk + 2 * trans_in

    cap = 48 << 20                       # v7x-safe (64 MiB physical VMEM per TC)
    try:                                 # allow more headroom on v5e/v6e (128 MiB)
        cap = max(cap, int(pltpu.get_tpu_info().vmem_capacity_bytes) * 3 // 4)
    except Exception:
        pass
    vmem_limit = int(min(max(need + (4 << 20), 16 << 20), cap))
    # TODO(synk): for very long S on v7x, chunk the sequence (forward kernel
    # streaming S-chunks with hist spilled to HBM + a reverse-streamed backtrack
    # kernel) instead of keeping the whole (S, T, bblk) block resident.

    cost = pl.CostEstimate(
        flops=3 * S * T * T * B,
        transcendentals=0,
        bytes_accessed=S * T * B * 4 + n_tiles * 8 * B * 4 + T * T * 4,
    )

    out = pl.pallas_call(
        _crf_viterbi_kernel,
        out_shape=jax.ShapeDtypeStruct((n_tiles, 8, B), jnp.int32),
        grid=(n_blocks,),
        in_specs=[
            pl.BlockSpec((S, T, bblk), lambda b: (0, 0, b)),
            pl.BlockSpec((T, T), lambda b: (0, 0)),
        ],
        out_specs=pl.BlockSpec((n_tiles, 8, bblk), lambda b: (0, 0, b)),
        scratch_shapes=[
            pltpu.VMEM((S, T, bblk), jnp.int32),
            pltpu.VMEM((T, T, bblk), jnp.float32),
        ],
        compiler_params=pltpu.CompilerParams(
            dimension_semantics=("parallel",),   # batch blocks -> megacore on v7x
            vmem_limit_bytes=vmem_limit,
        ),
        cost_estimate=cost,
    )(em, trans_t)

    tags = out.reshape(n_tiles * 8, B)[:S]       # (S, B), drop S padding rows
    return jnp.transpose(tags, (1, 0))           # (B, S)


def crf_decode_ref(emissions, transitions):
    """Pure-JAX reference mirroring the PyTorch forward()."""
    em = jnp.transpose(emissions, (1, 0, 2))
    S, B, T = em.shape
    score = em[0]
    history = []
    for t in range(1, S):
        s = score[:, :, None] + transitions[None, :, :] + em[t][:, None, :]
        score = jnp.max(s, axis=1)
        history.append(jnp.argmax(s, axis=1))
    best = jnp.argmax(score, axis=-1)
    tags = [best]
    for idx in reversed(history):
        best = jnp.take_along_axis(idx, best[:, None], axis=1)[:, 0]
        tags.append(best)
    tags.reverse()
    return jnp.stack(tags, axis=1).astype(jnp.int32)


if __name__ == "__main__":
    B, S, T = 2, 8, 8  # batch, seq_len, tags_num

    key = jax.random.PRNGKey(0)
    k_em, k_tr = jax.random.split(key)
    emissions = jax.random.normal(k_em, (B, S, T), dtype=jnp.float32)
    # nn.init.uniform_(transitions, -0.1, 0.1), deterministic
    transitions = jax.random.uniform(
        k_tr, (T, T), dtype=jnp.float32, minval=-0.1, maxval=0.1
    )

    out = jax.block_until_ready(crf_decode(emissions, transitions))
    ref = jax.block_until_ready(crf_decode_ref(emissions, transitions))

    assert out.shape == (B, S) and out.dtype == jnp.int32
    assert bool(jnp.all(out == ref)), (out, ref)

    print("KERNEL_OK")
</pallas_src>

<mosaic_0001>
module attributes {stable_mosaic.version = 11 : i64} {
  func.func @_crf_viterbi_kernel(%arg0: i32, %arg1: memref<8x8x2xf32, #tpu.memory_space<vmem>>, %arg2: memref<8x8xf32, #tpu.memory_space<vmem>>, %arg3: memref<1x8x2xi32, #tpu.memory_space<vmem>>, %arg4: memref<8x8x2xi32, #tpu.memory_space<vmem>>, %arg5: memref<8x8x2xf32, #tpu.memory_space<vmem>>) attributes {dimension_semantics = [#tpu.dimension_semantics<parallel>], iteration_bounds = array<i64: 1>, scalar_prefetch = 0 : i64, scratch_operands = 2 : i64, tpu.core_type = #tpu.core_type<tc>, window_params = [{transform_indices = @transform_0, window_bounds = array<i64: 8, 8, 2>}, {pipeline_mode = #tpu.pipeline_mode<synchronous>, transform_indices = @transform_1, window_bounds = array<i64: 8, 8>}, {transform_indices = @transform_2, window_bounds = array<i64: 1, 8, 2>}]} {
    %c0 = arith.constant 0 : index
    %c0_0 = arith.constant 0 : index
    %0 = vector.load %arg2[%c0, %c0_0] : memref<8x8xf32, #tpu.memory_space<vmem>>, vector<8x8xf32>
    %1 = vector.extract_strided_slice %0 {offsets = [0, 0], sizes = [8, 1], strides = [1, 1]} : vector<8x8xf32> to vector<8x1xf32>
    %2 = vector.shape_cast %1 : vector<8x1xf32> to vector<8x1xf32>
    %3 = vector.broadcast %2 : vector<8x1xf32> to vector<8x2xf32>
    %c0_1 = arith.constant 0 : index
    %c0_2 = arith.constant 0 : index
    %c0_3 = arith.constant 0 : index
    %4 = vector.load %arg5[%c0_1, %c0_2, %c0_3] : memref<8x8x2xf32, #tpu.memory_space<vmem>>, vector<1x8x2xf32>
    %5 = vector.shape_cast %4 : vector<1x8x2xf32> to vector<8x2xf32>
    %6 = vector.shape_cast %3 : vector<8x2xf32> to vector<1x8x2xf32>
    tpu.vector_store %arg5[%c0_1, %c0_2, %c0_3], %6 {strides = array<i32>} : memref<8x8x2xf32, #tpu.memory_space<vmem>>, vector<1x8x2xf32>,
    %7 = vector.extract_strided_slice %0 {offsets = [0, 1], sizes = [8, 1], strides = [1, 1]} : vector<8x8xf32> to vector<8x1xf32>
    %8 = vector.shape_cast %7 : vector<8x1xf32> to vector<8x1xf32>
    %9 = vector.broadcast %8 : vector<8x1xf32> to vector<8x2xf32>
    %c1 = arith.constant 1 : index
    %c0_4 = arith.constant 0 : index
    %c0_5 = arith.constant 0 : index
    %10 = vector.load %arg5[%c1, %c0_4, %c0_5] : memref<8x8x2xf32, #tpu.memory_space<vmem>>, vector<1x8x2xf32>
    %11 = vector.shape_cast %10 : vector<1x8x2xf32> to vector<8x2xf32>
    %12 = vector.shape_cast %9 : vector<8x2xf32> to vector<1x8x2xf32>
    tpu.vector_store %arg5[%c1, %c0_4, %c0_5], %12 {strides = array<i32>} : memref<8x8x2xf32, #tpu.memory_space<vmem>>, vector<1x8x2xf32>,
    %13 = vector.extract_strided_slice %0 {offsets = [0, 2], sizes = [8, 1], strides = [1, 1]} : vector<8x8xf32> to vector<8x1xf32>
    %14 = vector.shape_cast %13 : vector<8x1xf32> to vector<8x1xf32>
    %15 = vector.broadcast %14 : vector<8x1xf32> to vector<8x2xf32>
    %c2 = arith.constant 2 : index
    %c0_6 = arith.constant 0 : index
    %c0_7 = arith.constant 0 : index
    %16 = vector.load %arg5[%c2, %c0_6, %c0_7] : memref<8x8x2xf32, #tpu.memory_space<vmem>>, vector<1x8x2xf32>
    %17 = vector.shape_cast %16 : vector<1x8x2xf32> to vector<8x2xf32>
    %18 = vector.shape_cast %15 : vector<8x2xf32> to vector<1x8x2xf32>
    tpu.vector_store %arg5[%c2, %c0_6, %c0_7], %18 {strides = array<i32>} : memref<8x8x2xf32, #tpu.memory_space<vmem>>, vector<1x8x2xf32>,
    %19 = vector.extract_strided_slice %0 {offsets = [0, 3], sizes = [8, 1], strides = [1, 1]} : vector<8x8xf32> to vector<8x1xf32>
    %20 = vector.shape_cast %19 : vector<8x1xf32> to vector<8x1xf32>
    %21 = vector.broadcast %20 : vector<8x1xf32> to vector<8x2xf32>
    %c3 = arith.constant 3 : index
    %c0_8 = arith.constant 0 : index
    %c0_9 = arith.constant 0 : index
    %22 = vector.load %arg5[%c3, %c0_8, %c0_9] : memref<8x8x2xf32, #tpu.memory_space<vmem>>, vector<1x8x2xf32>
    %23 = vector.shape_cast %22 : vector<1x8x2xf32> to vector<8x2xf32>
    %24 = vector.shape_cast %21 : vector<8x2xf32> to vector<1x8x2xf32>
    tpu.vector_store %arg5[%c3, %c0_8, %c0_9], %24 {strides = array<i32>} : memref<8x8x2xf32, #tpu.memory_space<vmem>>, vector<1x8x2xf32>,
    %25 = vector.extract_strided_slice %0 {offsets = [0, 4], sizes = [8, 1], strides = [1, 1]} : vector<8x8xf32> to vector<8x1xf32>
    %26 = vector.shape_cast %25 : vector<8x1xf32> to vector<8x1xf32>
    %27 = vector.broadcast %26 : vector<8x1xf32> to vector<8x2xf32>
    %c4 = arith.constant 4 : index
    %c0_10 = arith.constant 0 : index
    %c0_11 = arith.constant 0 : index
    %28 = vector.load %arg5[%c4, %c0_10, %c0_11] : memref<8x8x2xf32, #tpu.memory_space<vmem>>, vector<1x8x2xf32>
    %29 = vector.shape_cast %28 : vector<1x8x2xf32> to vector<8x2xf32>
    %30 = vector.shape_cast %27 : vector<8x2xf32> to vector<1x8x2xf32>
    tpu.vector_store %arg5[%c4, %c0_10, %c0_11], %30 {strides = array<i32>} : memref<8x8x2xf32, #tpu.memory_space<vmem>>, vector<1x8x2xf32>,
    %31 = vector.extract_strided_slice %0 {offsets = [0, 5], sizes = [8, 1], strides = [1, 1]} : vector<8x8xf32> to vector<8x1xf32>
    %32 = vector.shape_cast %31 : vector<8x1xf32> to vector<8x1xf32>
    %33 = vector.broadcast %32 : vector<8x1xf32> to vector<8x2xf32>
    %c5 = arith.constant 5 : index
    %c0_12 = arith.constant 0 : index
    %c0_13 = arith.constant 0 : index
    %34 = vector.load %arg5[%c5, %c0_12, %c0_13] : memref<8x8x2xf32, #tpu.memory_space<vmem>>, vector<1x8x2xf32>
    %35 = vector.shape_cast %34 : vector<1x8x2xf32> to vector<8x2xf32>
    %36 = vector.shape_cast %33 : vector<8x2xf32> to vector<1x8x2xf32>
    tpu.vector_store %arg5[%c5, %c0_12, %c0_13], %36 {strides = array<i32>} : memref<8x8x2xf32, #tpu.memory_space<vmem>>, vector<1x8x2xf32>,
    %37 = vector.extract_strided_slice %0 {offsets = [0, 6], sizes = [8, 1], strides = [1, 1]} : vector<8x8xf32> to vector<8x1xf32>
    %38 = vector.shape_cast %37 : vector<8x1xf32> to vector<8x1xf32>
    %39 = vector.broadcast %38 : vector<8x1xf32> to vector<8x2xf32>
    %c6 = arith.constant 6 : index
    %c0_14 = arith.constant 0 : index
    %c0_15 = arith.constant 0 : index
    %40 = vector.load %arg5[%c6, %c0_14, %c0_15] : memref<8x8x2xf32, #tpu.memory_space<vmem>>, vector<1x8x2xf32>
    %41 = vector.shape_cast %40 : vector<1x8x2xf32> to vector<8x2xf32>
    %42 = vector.shape_cast %39 : vector<8x2xf32> to vector<1x8x2xf32>
    tpu.vector_store %arg5[%c6, %c0_14, %c0_15], %42 {strides = array<i32>} : memref<8x8x2xf32, #tpu.memory_space<vmem>>, vector<1x8x2xf32>,
    %43 = vector.extract_strided_slice %0 {offsets = [0, 7], sizes = [8, 1], strides = [1, 1]} : vector<8x8xf32> to vector<8x1xf32>
    %44 = vector.shape_cast %43 : vector<8x1xf32> to vector<8x1xf32>
    %45 = vector.broadcast %44 : vector<8x1xf32> to vector<8x2xf32>
    %c7 = arith.constant 7 : index
    %c0_16 = arith.constant 0 : index
    %c0_17 = arith.constant 0 : index
    %46 = vector.load %arg5[%c7, %c0_16, %c0_17] : memref<8x8x2xf32, #tpu.memory_space<vmem>>, vector<1x8x2xf32>
    %47 = vector.shape_cast %46 : vector<1x8x2xf32> to vector<8x2xf32>
    %48 = vector.shape_cast %45 : vector<8x2xf32> to vector<1x8x2xf32>
    tpu.vector_store %arg5[%c7, %c0_16, %c0_17], %48 {strides = array<i32>} : memref<8x8x2xf32, #tpu.memory_space<vmem>>, vector<1x8x2xf32>,
    %c0_18 = arith.constant 0 : index
    %c0_19 = arith.constant 0 : index
    %c0_20 = arith.constant 0 : index
    %49 = vector.load %arg1[%c0_18, %c0_19, %c0_20] : memref<8x8x2xf32, #tpu.memory_space<vmem>>, vector<1x8x2xf32>
    %50 = vector.shape_cast %49 : vector<1x8x2xf32> to vector<8x2xf32>
    %c1_i32 = arith.constant 1 : i32
    %51 = vector.extract_strided_slice %50 {offsets = [0, 0], sizes = [1, 2], strides = [1, 1]} : vector<8x2xf32> to vector<1x2xf32>
    %c0_21 = arith.constant 0 : index
    %c0_22 = arith.constant 0 : index
    %c0_23 = arith.constant 0 : index
    %52 = vector.load %arg5[%c0_21, %c0_22, %c0_23] : memref<8x8x2xf32, #tpu.memory_space<vmem>>, vector<1x8x2xf32>
    %53 = vector.shape_cast %52 : vector<1x8x2xf32> to vector<8x2xf32>
    %54 = vector.broadcast %51 : vector<1x2xf32> to vector<8x2xf32>
    %55 = arith.addf %54, %53 : vector<8x2xf32>
    %56 = vector.extract_strided_slice %50 {offsets = [1, 0], sizes = [1, 2], strides = [1, 1]} : vector<8x2xf32> to vector<1x2xf32>
    %c1_24 = arith.constant 1 : index
    %c0_25 = arith.constant 0 : index
    %c0_26 = arith.constant 0 : index
    %57 = vector.load %arg5[%c1_24, %c0_25, %c0_26] : memref<8x8x2xf32, #tpu.memory_space<vmem>>, vector<1x8x2xf32>
    %58 = vector.shape_cast %57 : vector<1x8x2xf32> to vector<8x2xf32>
    %59 = vector.broadcast %56 : vector<1x2xf32> to vector<8x2xf32>
    %60 = arith.addf %59, %58 : vector<8x2xf32>
    %61 = vector.extract_strided_slice %50 {offsets = [2, 0], sizes = [1, 2], strides = [1, 1]} : vector<8x2xf32> to vector<1x2xf32>
    %c2_27 = arith.constant 2 : index
    %c0_28 = arith.constant 0 : index
    %c0_29 = arith.constant 0 : index
    %62 = vector.load %arg5[%c2_27, %c0_28, %c0_29] : memref<8x8x2xf32, #tpu.memory_space<vmem>>, vector<1x8x2xf32>
    %63 = vector.shape_cast %62 : vector<1x8x2xf32> to vector<8x2xf32>
    %64 = vector.broadcast %61 : vector<1x2xf32> to vector<8x2xf32>
    %65 = arith.addf %64, %63 : vector<8x2xf32>
    %66 = vector.extract_strided_slice %50 {offsets = [3, 0], sizes = [1, 2], strides = [1, 1]} : vector<8x2xf32> to vector<1x2xf32>
    %c3_30 = arith.constant 3 : index
    %c0_31 = arith.constant 0 : index
    %c0_32 = arith.constant 0 : index
    %67 = vector.load %arg5[%c3_30, %c0_31, %c0_32] : memref<8x8x2xf32, #tpu.memory_space<vmem>>, vector<1x8x2xf32>
    %68 = vector.shape_cast %67 : vector<1x8x2xf32> to vector<8x2xf32>
    %69 = vector.broadcast %66 : vector<1x2xf32> to vector<8x2xf32>
    %70 = arith.addf %69, %68 : vector<8x2xf32>
    %71 = vector.extract_strided_slice %50 {offsets = [4, 0], sizes = [1, 2], strides = [1, 1]} : vector<8x2xf32> to vector<1x2xf32>
    %c4_33 = arith.constant 4 : index
    %c0_34 = arith.constant 0 : index
    %c0_35 = arith.constant 0 : index
    %72 = vector.load %arg5[%c4_33, %c0_34, %c0_35] : memref<8x8x2xf32, #tpu.memory_space<vmem>>, vector<1x8x2xf32>
    %73 = vector.shape_cast %72 : vector<1x8x2xf32> to vector<8x2xf32>
    %74 = vector.broadcast %71 : vector<1x2xf32> to vector<8x2xf32>
    %75 = arith.addf %74, %73 : vector<8x2xf32>
    %76 = vector.extract_strided_slice %50 {offsets = [5, 0], sizes = [1, 2], strides = [1, 1]} : vector<8x2xf32> to vector<1x2xf32>
    %c5_36 = arith.constant 5 : index
    %c0_37 = arith.constant 0 : index
    %c0_38 = arith.constant 0 : index
    %77 = vector.load %arg5[%c5_36, %c0_37, %c0_38] : memref<8x8x2xf32, #tpu.memory_space<vmem>>, vector<1x8x2xf32>
    %78 = vector.shape_cast %77 : vector<1x8x2xf32> to vector<8x2xf32>
    %79 = vector.broadcast %76 : vector<1x2xf32> to vector<8x2xf32>
    %80 = arith.addf %79, %78 : vector<8x2xf32>
    %81 = vector.extract_strided_slice %50 {offsets = [6, 0], sizes = [1, 2], strides = [1, 1]} : vector<8x2xf32> to vector<1x2xf32>
    %c6_39 = arith.constant 6 : index
    %c0_40 = arith.constant 0 : index
    %c0_41 = arith.constant 0 : index
    %82 = vector.load %arg5[%c6_39, %c0_40, %c0_41] : memref<8x8x2xf32, #tpu.memory_space<vmem>>, vector<1x8x2xf32>
    %83 = vector.shape_cast %82 : vector<1x8x2xf32> to vector<8x2xf32>
    %84 = vector.broadcast %81 : vector<1x2xf32> to vector<8x2xf32>
    %85 = arith.addf %84, %83 : vector<8x2xf32>
    %86 = vector.extract_strided_slice %50 {offsets = [7, 0], sizes = [1, 2], strides = [1, 1]} : vector<8x2xf32> to vector<1x2xf32>
    %c7_42 = arith.constant 7 : index
    %c0_43 = arith.constant 0 : index
    %c0_44 = arith.constant 0 : index
    %87 = vector.load %arg5[%c7_42, %c0_43, %c0_44] : memref<8x8x2xf32, #tpu.memory_space<vmem>>, vector<1x8x2xf32>
    %88 = vector.shape_cast %87 : vector<1x8x2xf32> to vector<8x2xf32>
    %89 = vector.broadcast %86 : vector<1x2xf32> to vector<8x2xf32>
    %90 = arith.addf %89, %88 : vector<8x2xf32>
    %91 = arith.cmpf ogt, %60, %55 : vector<8x2xf32>
    %92 = arith.maximumf %55, %60 : vector<8x2xf32>
    %c1_i32_45 = arith.constant 1 : i32
    %c0_i32 = arith.constant 0 : i32
    %93 = vector.broadcast %c1_i32_45 : i32 to vector<8x2xi32>
    %94 = vector.broadcast %c0_i32 : i32 to vector<8x2xi32>
    %95 = arith.select %91, %93, %94 : vector<8x2xi1>, vector<8x2xi32>
    %96 = arith.cmpf ogt, %70, %65 : vector<8x2xf32>
    %97 = arith.maximumf %65, %70 : vector<8x2xf32>
    %c3_i32 = arith.constant 3 : i32
    %c2_i32 = arith.constant 2 : i32
    %98 = vector.broadcast %c3_i32 : i32 to vector<8x2xi32>
    %99 = vector.broadcast %c2_i32 : i32 to vector<8x2xi32>
    %100 = arith.select %96, %98, %99 : vector<8x2xi1>, vector<8x2xi32>
    %101 = arith.cmpf ogt, %80, %75 : vector<8x2xf32>
    %102 = arith.maximumf %75, %80 : vector<8x2xf32>
    %c5_i32 = arith.constant 5 : i32
    %c4_i32 = arith.constant 4 : i32
    %103 = vector.broadcast %c5_i32 : i32 to vector<8x2xi32>
    %104 = vector.broadcast %c4_i32 : i32 to vector<8x2xi32>
    %105 = arith.select %101, %103, %104 : vector<8x2xi1>, vector<8x2xi32>
    %106 = arith.cmpf ogt, %90, %85 : vector<8x2xf32>
    %107 = arith.maximumf %85, %90 : vector<8x2xf32>
    %c7_i32 = arith.constant 7 : i32
    %c6_i32 = arith.constant 6 : i32
    %108 = vector.broadcast %c7_i32 : i32 to vector<8x2xi32>
    %109 = vector.broadcast %c6_i32 : i32 to vector<8x2xi32>
    %110 = arith.select %106, %108, %109 : vector<8x2xi1>, vector<8x2xi32>
    %111 = arith.cmpf ogt, %97, %92 : vector<8x2xf32>
    %112 = arith.maximumf %92, %97 : vector<8x2xf32>
    %113 = arith.select %111, %100, %95 : vector<8x2xi1>, vector<8x2xi32>
    %114 = arith.cmpf ogt, %107, %102 : vector<8x2xf32>
    %115 = arith.maximumf %102, %107 : vector<8x2xf32>
    %116 = arith.select %114, %110, %105 : vector<8x2xi1>, vector<8x2xi32>
    %117 = arith.cmpf ogt, %115, %112 : vector<8x2xf32>
    %118 = arith.maximumf %112, %115 : vector<8x2xf32>
    %119 = arith.select %117, %116, %113 : vector<8x2xi1>, vector<8x2xi32>
    %120 = arith.index_cast %c1_i32 : i32 to index
    %c0_46 = arith.constant 0 : index
    %c0_47 = arith.constant 0 : index
    %121 = vector.load %arg4[%120, %c0_46, %c0_47] : memref<8x8x2xi32, #tpu.memory_space<vmem>>, vector<1x8x2xi32>
    %122 = vector.shape_cast %121 : vector<1x8x2xi32> to vector<8x2xi32>
    %123 = vector.shape_cast %119 : vector<8x2xi32> to vector<1x8x2xi32>
    tpu.vector_store %arg4[%120, %c0_46, %c0_47], %123 {strides = array<i32>} : memref<8x8x2xi32, #tpu.memory_space<vmem>>, vector<1x8x2xi32>,
    %124 = arith.index_cast %c1_i32 : i32 to index
    %c0_48 = arith.constant 0 : index
    %c0_49 = arith.constant 0 : index
    %125 = vector.load %arg1[%124, %c0_48, %c0_49] : memref<8x8x2xf32, #tpu.memory_space<vmem>>, vector<1x8x2xf32>
    %126 = vector.shape_cast %125 : vector<1x8x2xf32> to vector<8x2xf32>
    %127 = arith.addf %118, %126 : vector<8x2xf32>
    %c2_i32_50 = arith.constant 2 : i32
    %128 = vector.extract_strided_slice %127 {offsets = [0, 0], sizes = [1, 2], strides = [1, 1]} : vector<8x2xf32> to vector<1x2xf32>
    %c0_51 = arith.constant 0 : index
    %c0_52 = arith.constant 0 : index
    %c0_53 = arith.constant 0 : index
    %129 = vector.load %arg5[%c0_51, %c0_52, %c0_53] : memref<8x8x2xf32, #tpu.memory_space<vmem>>, vector<1x8x2xf32>
    %130 = vector.shape_cast %129 : vector<1x8x2xf32> to vector<8x2xf32>
    %131 = vector.broadcast %128 : vector<1x2xf32> to vector<8x2xf32>
    %132 = arith.addf %131, %130 : vector<8x2xf32>
    %133 = vector.extract_strided_slice %127 {offsets = [1, 0], sizes = [1, 2], strides = [1, 1]} : vector<8x2xf32> to vector<1x2xf32>
    %c1_54 = arith.constant 1 : index
    %c0_55 = arith.constant 0 : index
    %c0_56 = arith.constant 0 : index
    %134 = vector.load %arg5[%c1_54, %c0_55, %c0_56] : memref<8x8x2xf32, #tpu.memory_space<vmem>>, vector<1x8x2xf32>
    %135 = vector.shape_cast %134 : vector<1x8x2xf32> to vector<8x2xf32>
    %136 = vector.broadcast %133 : vector<1x2xf32> to vector<8x2xf32>
    %137 = arith.addf %136, %135 : vector<8x2xf32>
    %138 = vector.extract_strided_slice %127 {offsets = [2, 0], sizes = [1, 2], strides = [1, 1]} : vector<8x2xf32> to vector<1x2xf32>
    %c2_57 = arith.constant 2 : index
    %c0_58 = arith.constant 0 : index
    %c0_59 = arith.constant 0 : index
    %139 = vector.load %arg5[%c2_57, %c0_58, %c0_59] : memref<8x8x2xf32, #tpu.memory_space<vmem>>, vector<1x8x2xf32>
    %140 = vector.shape_cast %139 : vector<1x8x2xf32> to vector<8x2xf32>
    %141 = vector.broadcast %138 : vector<1x2xf32> to vector<8x2xf32>
    %142 = arith.addf %141, %140 : vector<8x2xf32>
    %143 = vector.extract_strided_slice %127 {offsets = [3, 0], sizes = [1, 2], strides = [1, 1]} : vector<8x2xf32> to vector<1x2xf32>
    %c3_60 = arith.constant 3 : index
    %c0_61 = arith.constant 0 : index
    %c0_62 = arith.constant 0 : index
    %144 = vector.load %arg5[%c3_60, %c0_61, %c0_62] : memref<8x8x2xf32, #tpu.memory_space<vmem>>, vector<1x8x2xf32>
    %145 = vector.shape_cast %144 : vector<1x8x2xf32> to vector<8x2xf32>
    %146 = vector.broadcast %143 : vector<1x2xf32> to vector<8x2xf32>
    %147 = arith.addf %146, %145 : vector<8x2xf32>
    %148 = vector.extract_strided_slice %127 {offsets = [4, 0], sizes = [1, 2], strides = [1, 1]} : vector<8x2xf32> to vector<1x2xf32>
    %c4_63 = arith.constant 4 : index
    %c0_64 = arith.constant 0 : index
    %c0_65 = arith.constant 0 : index
    %149 = vector.load %arg5[%c4_63, %c0_64, %c0_65] : memref<8x8x2xf32, #tpu.memory_space<vmem>>, vector<1x8x2xf32>
    %150 = vector.shape_cast %149 : vector<1x8x2xf32> to vector<8x2xf32>
    %151 = vector.broadcast %148 : vector<1x2xf32> to vector<8x2xf32>
    %152 = arith.addf %151, %150 : vector<8x2xf32>
    %153 = vector.extract_strided_slice %127 {offsets = [5, 0], sizes = [1, 2], strides = [1, 1]} : vector<8x2xf32> to vector<1x2xf32>
    %c5_66 = arith.constant 5 : index
    %c0_67 = arith.constant 0 : index
    %c0_68 = arith.constant 0 : index
    %154 = vector.load %arg5[%c5_66, %c0_67, %c0_68] : memref<8x8x2xf32, #tpu.memory_space<vmem>>, vector<1x8x2xf32>
    %155 = vector.shape_cast %154 : vector<1x8x2xf32> to vector<8x2xf32>
    %156 = vector.broadcast %153 : vector<1x2xf32> to vector<8x2xf32>
    %157 = arith.addf %156, %155 : vector<8x2xf32>
    %158 = vector.extract_strided_slice %127 {offsets = [6, 0], sizes = [1, 2], strides = [1, 1]} : vector<8x2xf32> to vector<1x2xf32>
    %c6_69 = arith.constant 6 : index
    %c0_70 = arith.constant 0 : index
    %c0_71 = arith.constant 0 : index
    %159 = vector.load %arg5[%c6_69, %c0_70, %c0_71] : memref<8x8x2xf32, #tpu.memory_space<vmem>>, vector<1x8x2xf32>
    %160 = vector.shape_cast %159 : vector<1x8x2xf32> to vector<8x2xf32>
    %161 = vector.broadcast %158 : vector<1x2xf32> to vector<8x2xf32>
    %162 = arith.addf %161, %160 : vector<8x2xf32>
    %163 = vector.extract_strided_slice %127 {offsets = [7, 0], sizes = [1, 2], strides = [1, 1]} : vector<8x2xf32> to vector<1x2xf32>
    %c7_72 = arith.constant 7 : index
    %c0_73 = arith.constant 0 : index
    %c0_74 = arith.constant 0 : index
    %164 = vector.load %arg5[%c7_72, %c0_73, %c0_74] : memref<8x8x2xf32, #tpu.memory_space<vmem>>, vector<1x8x2xf32>
    %165 = vector.shape_cast %164 : vector<1x8x2xf32> to vector<8x2xf32>
    %166 = vector.broadcast %163 : vector<1x2xf32> to vector<8x2xf32>
    %167 = arith.addf %166, %165 : vector<8x2xf32>
    %168 = arith.cmpf ogt, %137, %132 : vector<8x2xf32>
    %169 = arith.maximumf %132, %137 : vector<8x2xf32>
    %c1_i32_75 = arith.constant 1 : i32
    %c0_i32_76 = arith.constant 0 : i32
    %170 = vector.broadcast %c1_i32_75 : i32 to vector<8x2xi32>
    %171 = vector.broadcast %c0_i32_76 : i32 to vector<8x2xi32>
    %172 = arith.select %168, %170, %171 : vector<8x2xi1>, vector<8x2xi32>
    %173 = arith.cmpf ogt, %147, %142 : vector<8x2xf32>
    %174 = arith.maximumf %142, %147 : vector<8x2xf32>
    %c3_i32_77 = arith.constant 3 : i32
    %c2_i32_78 = arith.constant 2 : i32
    %175 = vector.broadcast %c3_i32_77 : i32 to vector<8x2xi32>
    %176 = vector.broadcast %c2_i32_78 : i32 to vector<8x2xi32>
    %177 = arith.select %173, %175, %176 : vector<8x2xi1>, vector<8x2xi32>
    %178 = arith.cmpf ogt, %157, %152 : vector<8x2xf32>
    %179 = arith.maximumf %152, %157 : vector<8x2xf32>
    %c5_i32_79 = arith.constant 5 : i32
    %c4_i32_80 = arith.constant 4 : i32
    %180 = vector.broadcast %c5_i32_79 : i32 to vector<8x2xi32>
    %181 = vector.broadcast %c4_i32_80 : i32 to vector<8x2xi32>
    %182 = arith.select %178, %180, %181 : vector<8x2xi1>, vector<8x2xi32>
    %183 = arith.cmpf ogt, %167, %162 : vector<8x2xf32>
    %184 = arith.maximumf %162, %167 : vector<8x2xf32>
    %c7_i32_81 = arith.constant 7 : i32
    %c6_i32_82 = arith.constant 6 : i32
    %185 = vector.broadcast %c7_i32_81 : i32 to vector<8x2xi32>
    %186 = vector.broadcast %c6_i32_82 : i32 to vector<8x2xi32>
    %187 = arith.select %183, %185, %186 : vector<8x2xi1>, vector<8x2xi32>
    %188 = arith.cmpf ogt, %174, %169 : vector<8x2xf32>
    %189 = arith.maximumf %169, %174 : vector<8x2xf32>
    %190 = arith.select %188, %177, %172 : vector<8x2xi1>, vector<8x2xi32>
    %191 = arith.cmpf ogt, %184, %179 : vector<8x2xf32>
    %192 = arith.maximumf %179, %184 : vector<8x2xf32>
    %193 = arith.select %191, %187, %182 : vector<8x2xi1>, vector<8x2xi32>
    %194 = arith.cmpf ogt, %192, %189 : vector<8x2xf32>
    %195 = arith.maximumf %189, %192 : vector<8x2xf32>
    %196 = arith.select %194, %193, %190 : vector<8x2xi1>, vector<8x2xi32>
    %197 = arith.index_cast %c2_i32_50 : i32 to index
    %c0_83 = arith.constant 0 : index
    %c0_84 = arith.constant 0 : index
    %198 = vector.load %arg4[%197, %c0_83, %c0_84] : memref<8x8x2xi32, #tpu.memory_space<vmem>>, vector<1x8x2xi32>
    %199 = vector.shape_cast %198 : vector<1x8x2xi32> to vector<8x2xi32>
    %200 = vector.shape_cast %196 : vector<8x2xi32> to vector<1x8x2xi32>
    tpu.vector_store %arg4[%197, %c0_83, %c0_84], %200 {strides = array<i32>} : memref<8x8x2xi32, #tpu.memory_space<vmem>>, vector<1x8x2xi32>,
    %201 = arith.index_cast %c2_i32_50 : i32 to index
    %c0_85 = arith.constant 0 : index
    %c0_86 = arith.constant 0 : index
    %202 = vector.load %arg1[%201, %c0_85, %c0_86] : memref<8x8x2xf32, #tpu.memory_space<vmem>>, vector<1x8x2xf32>
    %203 = vector.shape_cast %202 : vector<1x8x2xf32> to vector<8x2xf32>
    %204 = arith.addf %195, %203 : vector<8x2xf32>
    %c3_i32_87 = arith.constant 3 : i32
    %205 = vector.extract_strided_slice %204 {offsets = [0, 0], sizes = [1, 2], strides = [1, 1]} : vector<8x2xf32> to vector<1x2xf32>
    %c0_88 = arith.constant 0 : index
    %c0_89 = arith.constant 0 : index
    %c0_90 = arith.constant 0 : index
    %206 = vector.load %arg5[%c0_88, %c0_89, %c0_90] : memref<8x8x2xf32, #tpu.memory_space<vmem>>, vector<1x8x2xf32>
    %207 = vector.shape_cast %206 : vector<1x8x2xf32> to vector<8x2xf32>
    %208 = vector.broadcast %205 : vector<1x2xf32> to vector<8x2xf32>
    %209 = arith.addf %208, %207 : vector<8x2xf32>
    %210 = vector.extract_strided_slice %204 {offsets = [1, 0], sizes = [1, 2], strides = [1, 1]} : vector<8x2xf32> to vector<1x2xf32>
    %c1_91 = arith.constant 1 : index
    %c0_92 = arith.constant 0 : index
    %c0_93 = arith.constant 0 : index
    %211 = vector.load %arg5[%c1_91, %c0_92, %c0_93] : memref<8x8x2xf32, #tpu.memory_space<vmem>>, vector<1x8x2xf32>
    %212 = vector.shape_cast %211 : vector<1x8x2xf32> to vector<8x2xf32>
    %213 = vector.broadcast %210 : vector<1x2xf32> to vector<8x2xf32>
    %214 = arith.addf %213, %212 : vector<8x2xf32>
    %215 = vector.extract_strided_slice %204 {offsets = [2, 0], sizes = [1, 2], strides = [1, 1]} : vector<8x2xf32> to vector<1x2xf32>
    %c2_94 = arith.constant 2 : index
    %c0_95 = arith.constant 0 : index
    %c0_96 = arith.constant 0 : index
    %216 = vector.load %arg5[%c2_94, %c0_95, %c0_96] : memref<8x8x2xf32, #tpu.memory_space<vmem>>, vector<1x8x2xf32>
    %217 = vector.shape_cast %216 : vector<1x8x2xf32> to vector<8x2xf32>
    %218 = vector.broadcast %215 : vector<1x2xf32> to vector<8x2xf32>
    %219 = arith.addf %218, %217 : vector<8x2xf32>
    %220 = vector.extract_strided_slice %204 {offsets = [3, 0], sizes = [1, 2], strides = [1, 1]} : vector<8x2xf32> to vector<1x2xf32>
    %c3_97 = arith.constant 3 : index
    %c0_98 = arith.constant 0 : index
    %c0_99 = arith.constant 0 : index
    %221 = vector.load %arg5[%c3_97, %c0_98, %c0_99] : memref<8x8x2xf32, #tpu.memory_space<vmem>>, vector<1x8x2xf32>
    %222 = vector.shape_cast %221 : vector<1x8x2xf32> to vector<8x2xf32>
    %223 = vector.broadcast %220 : vector<1x2xf32> to vector<8x2xf32>
    %224 = arith.addf %223, %222 : vector<8x2xf32>
    %225 = vector.extract_strided_slice %204 {offsets = [4, 0], sizes = [1, 2], strides = [1, 1]} : vector<8x2xf32> to vector<1x2xf32>
    %c4_100 = arith.constant 4 : index
    %c0_101 = arith.constant 0 : index
    %c0_102 = arith.constant 0 : index
    %226 = vector.load %arg5[%c4_100, %c0_101, %c0_102] : memref<8x8x2xf32, #tpu.memory_space<vmem>>, vector<1x8x2xf32>
    %227 = vector.shape_cast %226 : vector<1x8x2xf32> to vector<8x2xf32>
    %228 = vector.broadcast %225 : vector<1x2xf32> to vector<8x2xf32>
    %229 = arith.addf %228, %227 : vector<8x2xf32>
    %230 = vector.extract_strided_slice %204 {offsets = [5, 0], sizes = [1, 2], strides = [1, 1]} : vector<8x2xf32> to vector<1x2xf32>
    %c5_103 = arith.constant 5 : index
    %c0_104 = arith.constant 0 : index
    %c0_105 = arith.constant 0 : index
    %231 = vector.load %arg5[%c5_103, %c0_104, %c0_105] : memref<8x8x2xf32, #tpu.memory_space<vmem>>, vector<1x8x2xf32>
    %232 = vector.shape_cast %231 : vector<1x8x2xf32> to vector<8x2xf32>
    %233 = vector.broadcast %230 : vector<1x2xf32> to vector<8x2xf32>
    %234 = arith.addf %233, %232 : vector<8x2xf32>
    %235 = vector.extract_strided_slice %204 {offsets = [6, 0], sizes = [1, 2], strides = [1, 1]} : vector<8x2xf32> to vector<1x2xf32>
    %c6_106 = arith.constant 6 : index
    %c0_107 = arith.constant 0 : index
    %c0_108 = arith.constant 0 : index
    %236 = vector.load %arg5[%c6_106, %c0_107, %c0_108] : memref<8x8x2xf32, #tpu.memory_space<vmem>>, vector<1x8x2xf32>
    %237 = vector.shape_cast %236 : vector<1x8x2xf32> to vector<8x2xf32>
    %238 = vector.broadcast %235 : vector<1x2xf32> to vector<8x2xf32>
    %239 = arith.addf %238, %237 : vector<8x2xf32>
    %240 = vector.extract_strided_slice %204 {offsets = [7, 0], sizes = [1, 2], strides = [1, 1]} : vector<8x2xf32> to vector<1x2xf32>
    %c7_109 = arith.constant 7 : index
    %c0_110 = arith.constant 0 : index
    %c0_111 = arith.constant 0 : index
    %241 = vector.load %arg5[%c7_109, %c0_110, %c0_111] : memref<8x8x2xf32, #tpu.memory_space<vmem>>, vector<1x8x2xf32>
    %242 = vector.shape_cast %241 : vector<1x8x2xf32> to vector<8x2xf32>
    %243 = vector.broadcast %240 : vector<1x2xf32> to vector<8x2xf32>
    %244 = arith.addf %243, %242 : vector<8x2xf32>
    %245 = arith.cmpf ogt, %214, %209 : vector<8x2xf32>
    %246 = arith.maximumf %209, %214 : vector<8x2xf32>
    %c1_i32_112 = arith.constant 1 : i32
    %c0_i32_113 = arith.constant 0 : i32
    %247 = vector.broadcast %c1_i32_112 : i32 to vector<8x2xi32>
    %248 = vector.broadcast %c0_i32_113 : i32 to vector<8x2xi32>
    %249 = arith.select %245, %247, %248 : vector<8x2xi1>, vector<8x2xi32>
    %250 = arith.cmpf ogt, %224, %219 : vector<8x2xf32>
    %251 = arith.maximumf %219, %224 : vector<8x2xf32>
    %c3_i32_114 = arith.constant 3 : i32
    %c2_i32_115 = arith.constant 2 : i32
    %252 = vector.broadcast %c3_i32_114 : i32 to vector<8x2xi32>
    %253 = vector.broadcast %c2_i32_115 : i32 to vector<8x2xi32>
    %254 = arith.select %250, %252, %253 : vector<8x2xi1>, vector<8x2xi32>
    %255 = arith.cmpf ogt, %234, %229 : vector<8x2xf32>
    %256 = arith.maximumf %229, %234 : vector<8x2xf32>
    %c5_i32_116 = arith.constant 5 : i32
    %c4_i32_117 = arith.constant 4 : i32
    %257 = vector.broadcast %c5_i32_116 : i32 to vector<8x2xi32>
    %258 = vector.broadcast %c4_i32_117 : i32 to vector<8x2xi32>
    %259 = arith.select %255, %257, %258 : vector<8x2xi1>, vector<8x2xi32>
    %260 = arith.cmpf ogt, %244, %239 : vector<8x2xf32>
    %261 = arith.maximumf %239, %244 : vector<8x2xf32>
    %c7_i32_118 = arith.constant 7 : i32
    %c6_i32_119 = arith.constant 6 : i32
    %262 = vector.broadcast %c7_i32_118 : i32 to vector<8x2xi32>
    %263 = vector.broadcast %c6_i32_119 : i32 to vector<8x2xi32>
    %264 = arith.select %260, %262, %263 : vector<8x2xi1>, vector<8x2xi32>
    %265 = arith.cmpf ogt, %251, %246 : vector<8x2xf32>
    %266 = arith.maximumf %246, %251 : vector<8x2xf32>
    %267 = arith.select %265, %254, %249 : vector<8x2xi1>, vector<8x2xi32>
    %268 = arith.cmpf ogt, %261, %256 : vector<8x2xf32>
    %269 = arith.maximumf %256, %261 : vector<8x2xf32>
    %270 = arith.select %268, %264, %259 : vector<8x2xi1>, vector<8x2xi32>
    %271 = arith.cmpf ogt, %269, %266 : vector<8x2xf32>
    %272 = arith.maximumf %266, %269 : vector<8x2xf32>
    %273 = arith.select %271, %270, %267 : vector<8x2xi1>, vector<8x2xi32>
    %274 = arith.index_cast %c3_i32_87 : i32 to index
    %c0_120 = arith.constant 0 : index
    %c0_121 = arith.constant 0 : index
    %275 = vector.load %arg4[%274, %c0_120, %c0_121] : memref<8x8x2xi32, #tpu.memory_space<vmem>>, vector<1x8x2xi32>
    %276 = vector.shape_cast %275 : vector<1x8x2xi32> to vector<8x2xi32>
    %277 = vector.shape_cast %273 : vector<8x2xi32> to vector<1x8x2xi32>
    tpu.vector_store %arg4[%274, %c0_120, %c0_121], %277 {strides = array<i32>} : memref<8x8x2xi32, #tpu.memory_space<vmem>>, vector<1x8x2xi32>,
    %278 = arith.index_cast %c3_i32_87 : i32 to index
    %c0_122 = arith.constant 0 : index
    %c0_123 = arith.constant 0 : index
    %279 = vector.load %arg1[%278, %c0_122, %c0_123] : memref<8x8x2xf32, #tpu.memory_space<vmem>>, vector<1x8x2xf32>
    %280 = vector.shape_cast %279 : vector<1x8x2xf32> to vector<8x2xf32>
    %281 = arith.addf %272, %280 : vector<8x2xf32>
    %c4_i32_124 = arith.constant 4 : i32
    %282 = vector.extract_strided_slice %281 {offsets = [0, 0], sizes = [1, 2], strides = [1, 1]} : vector<8x2xf32> to vector<1x2xf32>
    %c0_125 = arith.constant 0 : index
    %c0_126 = arith.constant 0 : index
    %c0_127 = arith.constant 0 : index
    %283 = vector.load %arg5[%c0_125, %c0_126, %c0_127] : memref<8x8x2xf32, #tpu.memory_space<vmem>>, vector<1x8x2xf32>
    %284 = vector.shape_cast %283 : vector<1x8x2xf32> to vector<8x2xf32>
    %285 = vector.broadcast %282 : vector<1x2xf32> to vector<8x2xf32>
    %286 = arith.addf %285, %284 : vector<8x2xf32>
    %287 = vector.extract_strided_slice %281 {offsets = [1, 0], sizes = [1, 2], strides = [1, 1]} : vector<8x2xf32> to vector<1x2xf32>
    %c1_128 = arith.constant 1 : index
    %c0_129 = arith.constant 0 : index
    %c0_130 = arith.constant 0 : index
    %288 = vector.load %arg5[%c1_128, %c0_129, %c0_130] : memref<8x8x2xf32, #tpu.memory_space<vmem>>, vector<1x8x2xf32>
    %289 = vector.shape_cast %288 : vector<1x8x2xf32> to vector<8x2xf32>
    %290 = vector.broadcast %287 : vector<1x2xf32> to vector<8x2xf32>
    %291 = arith.addf %290, %289 : vector<8x2xf32>
    %292 = vector.extract_strided_slice %281 {offsets = [2, 0], sizes = [1, 2], strides = [1, 1]} : vector<8x2xf32> to vector<1x2xf32>
    %c2_131 = arith.constant 2 : index
    %c0_132 = arith.constant 0 : index
    %c0_133 = arith.constant 0 : index
    %293 = vector.load %arg5[%c2_131, %c0_132, %c0_133] : memref<8x8x2xf32, #tpu.memory_space<vmem>>, vector<1x8x2xf32>
    %294 = vector.shape_cast %293 : vector<1x8x2xf32> to vector<8x2xf32>
    %295 = vector.broadcast %292 : vector<1x2xf32> to vector<8x2xf32>
    %296 = arith.addf %295, %294 : vector<8x2xf32>
    %297 = vector.extract_strided_slice %281 {offsets = [3, 0], sizes = [1, 2], strides = [1, 1]} : vector<8x2xf32> to vector<1x2xf32>
    %c3_134 = arith.constant 3 : index
    %c0_135 = arith.constant 0 : index
    %c0_136 = arith.constant 0 : index
    %298 = vector.load %arg5[%c3_134, %c0_135, %c0_136] : memref<8x8x2xf32, #tpu.memory_space<vmem>>, vector<1x8x2xf32>
    %299 = vector.shape_cast %298 : vector<1x8x2xf32> to vector<8x2xf32>
    %300 = vector.broadcast %297 : vector<1x2xf32> to vector<8x2xf32>
    %301 = arith.addf %300, %299 : vector<8x2xf32>
    %302 = vector.extract_strided_slice %281 {offsets = [4, 0], sizes = [1, 2], strides = [1, 1]} : vector<8x2xf32> to vector<1x2xf32>
    %c4_137 = arith.constant 4 : index
    %c0_138 = arith.constant 0 : index
    %c0_139 = arith.constant 0 : index
    %303 = vector.load %arg5[%c4_137, %c0_138, %c0_139] : memref<8x8x2xf32, #tpu.memory_space<vmem>>, vector<1x8x2xf32>
    %304 = vector.shape_cast %303 : vector<1x8x2xf32> to vector<8x2xf32>
    %305 = vector.broadcast %302 : vector<1x2xf32> to vector<8x2xf32>
    %306 = arith.addf %305, %304 : vector<8x2xf32>
    %307 = vector.extract_strided_slice %281 {offsets = [5, 0], sizes = [1, 2], strides = [1, 1]} : vector<8x2xf32> to vector<1x2xf32>
    %c5_140 = arith.constant 5 : index
    %c0_141 = arith.constant 0 : index
    %c0_142 = arith.constant 0 : index
    %308 = vector.load %arg5[%c5_140, %c0_141, %c0_142] : memref<8x8x2xf32, #tpu.memory_space<vmem>>, vector<1x8x2xf32>
    %309 = vector.shape_cast %308 : vector<1x8x2xf32> to vector<8x2xf32>
    %310 = vector.broadcast %307 : vector<1x2xf32> to vector<8x2xf32>
    %311 = arith.addf %310, %309 : vector<8x2xf32>
    %312 = vector.extract_strided_slice %281 {offsets = [6, 0], sizes = [1, 2], strides = [1, 1]} : vector<8x2xf32> to vector<1x2xf32>
    %c6_143 = arith.constant 6 : index
    %c0_144 = arith.constant 0 : index
    %c0_145 = arith.constant 0 : index
    %313 = vector.load %arg5[%c6_143, %c0_144, %c0_145] : memref<8x8x2xf32, #tpu.memory_space<vmem>>, vector<1x8x2xf32>
    %314 = vector.shape_cast %313 : vector<1x8x2xf32> to vector<8x2xf32>
    %315 = vector.broadcast %312 : vector<1x2xf32> to vector<8x2xf32>
    %316 = arith.addf %315, %314 : vector<8x2xf32>
    %317 = vector.extract_strided_slice %281 {offsets = [7, 0], sizes = [1, 2], strides = [1, 1]} : vector<8x2xf32> to vector<1x2xf32>
    %c7_146 = arith.constant 7 : index
    %c0_147 = arith.constant 0 : index
    %c0_148 = arith.constant 0 : index
    %318 = vector.load %arg5[%c7_146, %c0_147, %c0_148] : memref<8x8x2xf32, #tpu.memory_space<vmem>>, vector<1x8x2xf32>
    %319 = vector.shape_cast %318 : vector<1x8x2xf32> to vector<8x2xf32>
    %320 = vector.broadcast %317 : vector<1x2xf32> to vector<8x2xf32>
    %321 = arith.addf %320, %319 : vector<8x2xf32>
    %322 = arith.cmpf ogt, %291, %286 : vector<8x2xf32>
    %323 = arith.maximumf %286, %291 : vector<8x2xf32>
    %c1_i32_149 = arith.constant 1 : i32
    %c0_i32_150 = arith.constant 0 : i32
    %324 = vector.broadcast %c1_i32_149 : i32 to vector<8x2xi32>
    %325 = vector.broadcast %c0_i32_150 : i32 to vector<8x2xi32>
    %326 = arith.select %322, %324, %325 : vector<8x2xi1>, vector<8x2xi32>
    %327 = arith.cmpf ogt, %301, %296 : vector<8x2xf32>
    %328 = arith.maximumf %296, %301 : vector<8x2xf32>
    %c3_i32_151 = arith.constant 3 : i32
    %c2_i32_152 = arith.constant 2 : i32
    %329 = vector.broadcast %c3_i32_151 : i32 to vector<8x2xi32>
    %330 = vector.broadcast %c2_i32_152 : i32 to vector<8x2xi32>
    %331 = arith.select %327, %329, %330 : vector<8x2xi1>, vector<8x2xi32>
    %332 = arith.cmpf ogt, %311, %306 : vector<8x2xf32>
    %333 = arith.maximumf %306, %311 : vector<8x2xf32>
    %c5_i32_153 = arith.constant 5 : i32
    %c4_i32_154 = arith.constant 4 : i32
    %334 = vector.broadcast %c5_i32_153 : i32 to vector<8x2xi32>
    %335 = vector.broadcast %c4_i32_154 : i32 to vector<8x2xi32>
    %336 = arith.select %332, %334, %335 : vector<8x2xi1>, vector<8x2xi32>
    %337 = arith.cmpf ogt, %321, %316 : vector<8x2xf32>
    %338 = arith.maximumf %316, %321 : vector<8x2xf32>
    %c7_i32_155 = arith.constant 7 : i32
    %c6_i32_156 = arith.constant 6 : i32
    %339 = vector.broadcast %c7_i32_155 : i32 to vector<8x2xi32>
    %340 = vector.broadcast %c6_i32_156 : i32 to vector<8x2xi32>
    %341 = arith.select %337, %339, %340 : vector<8x2xi1>, vector<8x2xi32>
    %342 = arith.cmpf ogt, %328, %323 : vector<8x2xf32>
    %343 = arith.maximumf %323, %328 : vector<8x2xf32>
    %344 = arith.select %342, %331, %326 : vector<8x2xi1>, vector<8x2xi32>
    %345 = arith.cmpf ogt, %338, %333 : vector<8x2xf32>
    %346 = arith.maximumf %333, %338 : vector<8x2xf32>
    %347 = arith.select %345, %341, %336 : vector<8x2xi1>, vector<8x2xi32>
    %348 = arith.cmpf ogt, %346, %343 : vector<8x2xf32>
    %349 = arith.maximumf %343, %346 : vector<8x2xf32>
    %350 = arith.select %348, %347, %344 : vector<8x2xi1>, vector<8x2xi32>
    %351 = arith.index_cast %c4_i32_124 : i32 to index
    %c0_157 = arith.constant 0 : index
    %c0_158 = arith.constant 0 : index
    %352 = vector.load %arg4[%351, %c0_157, %c0_158] : memref<8x8x2xi32, #tpu.memory_space<vmem>>, vector<1x8x2xi32>
    %353 = vector.shape_cast %352 : vector<1x8x2xi32> to vector<8x2xi32>
    %354 = vector.shape_cast %350 : vector<8x2xi32> to vector<1x8x2xi32>
    tpu.vector_store %arg4[%351, %c0_157, %c0_158], %354 {strides = array<i32>} : memref<8x8x2xi32, #tpu.memory_space<vmem>>, vector<1x8x2xi32>,
    %355 = arith.index_cast %c4_i32_124 : i32 to index
    %c0_159 = arith.constant 0 : index
    %c0_160 = arith.constant 0 : index
    %356 = vector.load %arg1[%355, %c0_159, %c0_160] : memref<8x8x2xf32, #tpu.memory_space<vmem>>, vector<1x8x2xf32>
    %357 = vector.shape_cast %356 : vector<1x8x2xf32> to vector<8x2xf32>
    %358 = arith.addf %349, %357 : vector<8x2xf32>
    %c5_i32_161 = arith.constant 5 : i32
    %359 = vector.extract_strided_slice %358 {offsets = [0, 0], sizes = [1, 2], strides = [1, 1]} : vector<8x2xf32> to vector<1x2xf32>
    %c0_162 = arith.constant 0 : index
    %c0_163 = arith.constant 0 : index
    %c0_164 = arith.constant 0 : index
    %360 = vector.load %arg5[%c0_162, %c0_163, %c0_164] : memref<8x8x2xf32, #tpu.memory_space<vmem>>, vector<1x8x2xf32>
    %361 = vector.shape_cast %360 : vector<1x8x2xf32> to vector<8x2xf32>
    %362 = vector.broadcast %359 : vector<1x2xf32> to vector<8x2xf32>
    %363 = arith.addf %362, %361 : vector<8x2xf32>
    %364 = vector.extract_strided_slice %358 {offsets = [1, 0], sizes = [1, 2], strides = [1, 1]} : vector<8x2xf32> to vector<1x2xf32>
    %c1_165 = arith.constant 1 : index
    %c0_166 = arith.constant 0 : index
    %c0_167 = arith.constant 0 : index
    %365 = vector.load %arg5[%c1_165, %c0_166, %c0_167] : memref<8x8x2xf32, #tpu.memory_space<vmem>>, vector<1x8x2xf32>
    %366 = vector.shape_cast %365 : vector<1x8x2xf32> to vector<8x2xf32>
    %367 = vector.broadcast %364 : vector<1x2xf32> to vector<8x2xf32>
    %368 = arith.addf %367, %366 : vector<8x2xf32>
    %369 = vector.extract_strided_slice %358 {offsets = [2, 0], sizes = [1, 2], strides = [1, 1]} : vector<8x2xf32> to vector<1x2xf32>
    %c2_168 = arith.constant 2 : index
    %c0_169 = arith.constant 0 : index
    %c0_170 = arith.constant 0 : index
    %370 = vector.load %arg5[%c2_168, %c0_169, %c0_170] : memref<8x8x2xf32, #tpu.memory_space<vmem>>, vector<1x8x2xf32>
    %371 = vector.shape_cast %370 : vector<1x8x2xf32> to vector<8x2xf32>
    %372 = vector.broadcast %369 : vector<1x2xf32> to vector<8x2xf32>
    %373 = arith.addf %372, %371 : vector<8x2xf32>
    %374 = vector.extract_strided_slice %358 {offsets = [3, 0], sizes = [1, 2], strides = [1, 1]} : vector<8x2xf32> to vector<1x2xf32>
    %c3_171 = arith.constant 3 : index
    %c0_172 = arith.constant 0 : index
    %c0_173 = arith.constant 0 : index
    %375 = vector.load %arg5[%c3_171, %c0_172, %c0_173] : memref<8x8x2xf32, #tpu.memory_space<vmem>>, vector<1x8x2xf32>
    %376 = vector.shape_cast %375 : vector<1x8x2xf32> to vector<8x2xf32>
    %377 = vector.broadcast %374 : vector<1x2xf32> to vector<8x2xf32>
    %378 = arith.addf %377, %376 : vector<8x2xf32>
    %379 = vector.extract_strided_slice %358 {offsets = [4, 0], sizes = [1, 2], strides = [1, 1]} : vector<8x2xf32> to vector<1x2xf32>
    %c4_174 = arith.constant 4 : index
    %c0_175 = arith.constant 0 : index
    %c0_176 = arith.constant 0 : index
    %380 = vector.load %arg5[%c4_174, %c0_175, %c0_176] : memref<8x8x2xf32, #tpu.memory_space<vmem>>, vector<1x8x2xf32>
    %381 = vector.shape_cast %380 : vector<1x8x2xf32> to vector<8x2xf32>
    %382 = vector.broadcast %379 : vector<1x2xf32> to vector<8x2xf32>
    %383 = arith.addf %382, %381 : vector<8x2xf32>
    %384 = vector.extract_strided_slice %358 {offsets = [5, 0], sizes = [1, 2], strides = [1, 1]} : vector<8x2xf32> to vector<1x2xf32>
    %c5_177 = arith.constant 5 : index
    %c0_178 = arith.constant 0 : index
    %c0_179 = arith.constant 0 : index
    %385 = vector.load %arg5[%c5_177, %c0_178, %c0_179] : memref<8x8x2xf32, #tpu.memory_space<vmem>>, vector<1x8x2xf32>
    %386 = vector.shape_cast %385 : vector<1x8x2xf32> to vector<8x2xf32>
    %387 = vector.broadcast %384 : vector<1x2xf32> to vector<8x2xf32>
    %388 = arith.addf %387, %386 : vector<8x2xf32>
    %389 = vector.extract_strided_slice %358 {offsets = [6, 0], sizes = [1, 2], strides = [1, 1]} : vector<8x2xf32> to vector<1x2xf32>
    %c6_180 = arith.constant 6 : index
    %c0_181 = arith.constant 0 : index
    %c0_182 = arith.constant 0 : index
    %390 = vector.load %arg5[%c6_180, %c0_181, %c0_182] : memref<8x8x2xf32, #tpu.memory_space<vmem>>, vector<1x8x2xf32>
    %391 = vector.shape_cast %390 : vector<1x8x2xf32> to vector<8x2xf32>
    %392 = vector.broadcast %389 : vector<1x2xf32> to vector<8x2xf32>
    %393 = arith.addf %392, %391 : vector<8x2xf32>
    %394 = vector.extract_strided_slice %358 {offsets = [7, 0], sizes = [1, 2], strides = [1, 1]} : vector<8x2xf32> to vector<1x2xf32>
    %c7_183 = arith.constant 7 : index
    %c0_184 = arith.constant 0 : index
    %c0_185 = arith.constant 0 : index
    %395 = vector.load %arg5[%c7_183, %c0_184, %c0_185] : memref<8x8x2xf32, #tpu.memory_space<vmem>>, vector<1x8x2xf32>
    %396 = vector.shape_cast %395 : vector<1x8x2xf32> to vector<8x2xf32>
    %397 = vector.broadcast %394 : vector<1x2xf32> to vector<8x2xf32>
    %398 = arith.addf %397, %396 : vector<8x2xf32>
    %399 = arith.cmpf ogt, %368, %363 : vector<8x2xf32>
    %400 = arith.maximumf %363, %368 : vector<8x2xf32>
    %c1_i32_186 = arith.constant 1 : i32
    %c0_i32_187 = arith.constant 0 : i32
    %401 = vector.broadcast %c1_i32_186 : i32 to vector<8x2xi32>
    %402 = vector.broadcast %c0_i32_187 : i32 to vector<8x2xi32>
    %403 = arith.select %399, %401, %402 : vector<8x2xi1>, vector<8x2xi32>
    %404 = arith.cmpf ogt, %378, %373 : vector<8x2xf32>
    %405 = arith.maximumf %373, %378 : vector<8x2xf32>
    %c3_i32_188 = arith.constant 3 : i32
    %c2_i32_189 = arith.constant 2 : i32
    %406 = vector.broadcast %c3_i32_188 : i32 to vector<8x2xi32>
    %407 = vector.broadcast %c2_i32_189 : i32 to vector<8x2xi32>
    %408 = arith.select %404, %406, %407 : vector<8x2xi1>, vector<8x2xi32>
    %409 = arith.cmpf ogt, %388, %383 : vector<8x2xf32>
    %410 = arith.maximumf %383, %388 : vector<8x2xf32>
    %c5_i32_190 = arith.constant 5 : i32
    %c4_i32_191 = arith.constant 4 : i32
    %411 = vector.broadcast %c5_i32_190 : i32 to vector<8x2xi32>
    %412 = vector.broadcast %c4_i32_191 : i32 to vector<8x2xi32>
    %413 = arith.select %409, %411, %412 : vector<8x2xi1>, vector<8x2xi32>
    %414 = arith.cmpf ogt, %398, %393 : vector<8x2xf32>
    %415 = arith.maximumf %393, %398 : vector<8x2xf32>
    %c7_i32_192 = arith.constant 7 : i32
    %c6_i32_193 = arith.constant 6 : i32
    %416 = vector.broadcast %c7_i32_192 : i32 to vector<8x2xi32>
    %417 = vector.broadcast %c6_i32_193 : i32 to vector<8x2xi32>
    %418 = arith.select %414, %416, %417 : vector<8x2xi1>, vector<8x2xi32>
    %419 = arith.cmpf ogt, %405, %400 : vector<8x2xf32>
    %420 = arith.maximumf %400, %405 : vector<8x2xf32>
    %421 = arith.select %419, %408, %403 : vector<8x2xi1>, vector<8x2xi32>
    %422 = arith.cmpf ogt, %415, %410 : vector<8x2xf32>
    %423 = arith.maximumf %410, %415 : vector<8x2xf32>
    %424 = arith.select %422, %418, %413 : vector<8x2xi1>, vector<8x2xi32>
    %425 = arith.cmpf ogt, %423, %420 : vector<8x2xf32>
    %426 = arith.maximumf %420, %423 : vector<8x2xf32>
    %427 = arith.select %425, %424, %421 : vector<8x2xi1>, vector<8x2xi32>
    %428 = arith.index_cast %c5_i32_161 : i32 to index
    %c0_194 = arith.constant 0 : index
    %c0_195 = arith.constant 0 : index
    %429 = vector.load %arg4[%428, %c0_194, %c0_195] : memref<8x8x2xi32, #tpu.memory_space<vmem>>, vector<1x8x2xi32>
    %430 = vector.shape_cast %429 : vector<1x8x2xi32> to vector<8x2xi32>
    %431 = vector.shape_cast %427 : vector<8x2xi32> to vector<1x8x2xi32>
    tpu.vector_store %arg4[%428, %c0_194, %c0_195], %431 {strides = array<i32>} : memref<8x8x2xi32, #tpu.memory_space<vmem>>, vector<1x8x2xi32>,
    %432 = arith.index_cast %c5_i32_161 : i32 to index
    %c0_196 = arith.constant 0 : index
    %c0_197 = arith.constant 0 : index
    %433 = vector.load %arg1[%432, %c0_196, %c0_197] : memref<8x8x2xf32, #tpu.memory_space<vmem>>, vector<1x8x2xf32>
    %434 = vector.shape_cast %433 : vector<1x8x2xf32> to vector<8x2xf32>
    %435 = arith.addf %426, %434 : vector<8x2xf32>
    %c6_i32_198 = arith.constant 6 : i32
    %436 = vector.extract_strided_slice %435 {offsets = [0, 0], sizes = [1, 2], strides = [1, 1]} : vector<8x2xf32> to vector<1x2xf32>
    %c0_199 = arith.constant 0 : index
    %c0_200 = arith.constant 0 : index
    %c0_201 = arith.constant 0 : index
    %437 = vector.load %arg5[%c0_199, %c0_200, %c0_201] : memref<8x8x2xf32, #tpu.memory_space<vmem>>, vector<1x8x2xf32>
    %438 = vector.shape_cast %437 : vector<1x8x2xf32> to vector<8x2xf32>
    %439 = vector.broadcast %436 : vector<1x2xf32> to vector<8x2xf32>
    %440 = arith.addf %439, %438 : vector<8x2xf32>
    %441 = vector.extract_strided_slice %435 {offsets = [1, 0], sizes = [1, 2], strides = [1, 1]} : vector<8x2xf32> to vector<1x2xf32>
    %c1_202 = arith.constant 1 : index
    %c0_203 = arith.constant 0 : index
    %c0_204 = arith.constant 0 : index
    %442 = vector.load %arg5[%c1_202, %c0_203, %c0_204] : memref<8x8x2xf32, #tpu.memory_space<vmem>>, vector<1x8x2xf32>
    %443 = vector.shape_cast %442 : vector<1x8x2xf32> to vector<8x2xf32>
    %444 = vector.broadcast %441 : vector<1x2xf32> to vector<8x2xf32>
    %445 = arith.addf %444, %443 : vector<8x2xf32>
    %446 = vector.extract_strided_slice %435 {offsets = [2, 0], sizes = [1, 2], strides = [1, 1]} : vector<8x2xf32> to vector<1x2xf32>
    %c2_205 = arith.constant 2 : index
    %c0_206 = arith.constant 0 : index
    %c0_207 = arith.constant 0 : index
    %447 = vector.load %arg5[%c2_205, %c0_206, %c0_207] : memref<8x8x2xf32, #tpu.memory_space<vmem>>, vector<1x8x2xf32>
    %448 = vector.shape_cast %447 : vector<1x8x2xf32> to vector<8x2xf32>
    %449 = vector.broadcast %446 : vector<1x2xf32> to vector<8x2xf32>
    %450 = arith.addf %449, %448 : vector<8x2xf32>
    %451 = vector.extract_strided_slice %435 {offsets = [3, 0], sizes = [1, 2], strides = [1, 1]} : vector<8x2xf32> to vector<1x2xf32>
    %c3_208 = arith.constant 3 : index
    %c0_209 = arith.constant 0 : index
    %c0_210 = arith.constant 0 : index
    %452 = vector.load %arg5[%c3_208, %c0_209, %c0_210] : memref<8x8x2xf32, #tpu.memory_space<vmem>>, vector<1x8x2xf32>
    %453 = vector.shape_cast %452 : vector<1x8x2xf32> to vector<8x2xf32>
    %454 = vector.broadcast %451 : vector<1x2xf32> to vector<8x2xf32>
    %455 = arith.addf %454, %453 : vector<8x2xf32>
    %456 = vector.extract_strided_slice %435 {offsets = [4, 0], sizes = [1, 2], strides = [1, 1]} : vector<8x2xf32> to vector<1x2xf32>
    %c4_211 = arith.constant 4 : index
    %c0_212 = arith.constant 0 : index
    %c0_213 = arith.constant 0 : index
    %457 = vector.load %arg5[%c4_211, %c0_212, %c0_213] : memref<8x8x2xf32, #tpu.memory_space<vmem>>, vector<1x8x2xf32>
    %458 = vector.shape_cast %457 : vector<1x8x2xf32> to vector<8x2xf32>
    %459 = vector.broadcast %456 : vector<1x2xf32> to vector<8x2xf32>
    %460 = arith.addf %459, %458 : vector<8x2xf32>
    %461 = vector.extract_strided_slice %435 {offsets = [5, 0], sizes = [1, 2], strides = [1, 1]} : vector<8x2xf32> to vector<1x2xf32>
    %c5_214 = arith.constant 5 : index
    %c0_215 = arith.constant 0 : index
    %c0_216 = arith.constant 0 : index
    %462 = vector.load %arg5[%c5_214, %c0_215, %c0_216] : memref<8x8x2xf32, #tpu.memory_space<vmem>>, vector<1x8x2xf32>
    %463 = vector.shape_cast %462 : vector<1x8x2xf32> to vector<8x2xf32>
    %464 = vector.broadcast %461 : vector<1x2xf32> to vector<8x2xf32>
    %465 = arith.addf %464, %463 : vector<8x2xf32>
    %466 = vector.extract_strided_slice %435 {offsets = [6, 0], sizes = [1, 2], strides = [1, 1]} : vector<8x2xf32> to vector<1x2xf32>
    %c6_217 = arith.constant 6 : index
    %c0_218 = arith.constant 0 : index
    %c0_219 = arith.constant 0 : index
    %467 = vector.load %arg5[%c6_217, %c0_218, %c0_219] : memref<8x8x2xf32, #tpu.memory_space<vmem>>, vector<1x8x2xf32>
    %468 = vector.shape_cast %467 : vector<1x8x2xf32> to vector<8x2xf32>
    %469 = vector.broadcast %466 : vector<1x2xf32> to vector<8x2xf32>
    %470 = arith.addf %469, %468 : vector<8x2xf32>
    %471 = vector.extract_strided_slice %435 {offsets = [7, 0], sizes = [1, 2], strides = [1, 1]} : vector<8x2xf32> to vector<1x2xf32>
    %c7_220 = arith.constant 7 : index
    %c0_221 = arith.constant 0 : index
    %c0_222 = arith.constant 0 : index
    %472 = vector.load %arg5[%c7_220, %c0_221, %c0_222] : memref<8x8x2xf32, #tpu.memory_space<vmem>>, vector<1x8x2xf32>
    %473 = vector.shape_cast %472 : vector<1x8x2xf32> to vector<8x2xf32>
    %474 = vector.broadcast %471 : vector<1x2xf32> to vector<8x2xf32>
    %475 = arith.addf %474, %473 : vector<8x2xf32>
    %476 = arith.cmpf ogt, %445, %440 : vector<8x2xf32>
    %477 = arith.maximumf %440, %445 : vector<8x2xf32>
    %c1_i32_223 = arith.constant 1 : i32
    %c0_i32_224 = arith.constant 0 : i32
    %478 = vector.broadcast %c1_i32_223 : i32 to vector<8x2xi32>
    %479 = vector.broadcast %c0_i32_224 : i32 to vector<8x2xi32>
    %480 = arith.select %476, %478, %479 : vector<8x2xi1>, vector<8x2xi32>
    %481 = arith.cmpf ogt, %455, %450 : vector<8x2xf32>
    %482 = arith.maximumf %450, %455 : vector<8x2xf32>
    %c3_i32_225 = arith.constant 3 : i32
    %c2_i32_226 = arith.constant 2 : i32
    %483 = vector.broadcast %c3_i32_225 : i32 to vector<8x2xi32>
    %484 = vector.broadcast %c2_i32_226 : i32 to vector<8x2xi32>
    %485 = arith.select %481, %483, %484 : vector<8x2xi1>, vector<8x2xi32>
    %486 = arith.cmpf ogt, %465, %460 : vector<8x2xf32>
    %487 = arith.maximumf %460, %465 : vector<8x2xf32>
    %c5_i32_227 = arith.constant 5 : i32
    %c4_i32_228 = arith.constant 4 : i32
    %488 = vector.broadcast %c5_i32_227 : i32 to vector<8x2xi32>
    %489 = vector.broadcast %c4_i32_228 : i32 to vector<8x2xi32>
    %490 = arith.select %486, %488, %489 : vector<8x2xi1>, vector<8x2xi32>
    %491 = arith.cmpf ogt, %475, %470 : vector<8x2xf32>
    %492 = arith.maximumf %470, %475 : vector<8x2xf32>
    %c7_i32_229 = arith.constant 7 : i32
    %c6_i32_230 = arith.constant 6 : i32
    %493 = vector.broadcast %c7_i32_229 : i32 to vector<8x2xi32>
    %494 = vector.broadcast %c6_i32_230 : i32 to vector<8x2xi32>
    %495 = arith.select %491, %493, %494 : vector<8x2xi1>, vector<8x2xi32>
    %496 = arith.cmpf ogt, %482, %477 : vector<8x2xf32>
    %497 = arith.maximumf %477, %482 : vector<8x2xf32>
    %498 = arith.select %496, %485, %480 : vector<8x2xi1>, vector<8x2xi32>
    %499 = arith.cmpf ogt, %492, %487 : vector<8x2xf32>
    %500 = arith.maximumf %487, %492 : vector<8x2xf32>
    %501 = arith.select %499, %495, %490 : vector<8x2xi1>, vector<8x2xi32>
    %502 = arith.cmpf ogt, %500, %497 : vector<8x2xf32>
    %503 = arith.maximumf %497, %500 : vector<8x2xf32>
    %504 = arith.select %502, %501, %498 : vector<8x2xi1>, vector<8x2xi32>
    %505 = arith.index_cast %c6_i32_198 : i32 to index
    %c0_231 = arith.constant 0 : index
    %c0_232 = arith.constant 0 : index
    %506 = vector.load %arg4[%505, %c0_231, %c0_232] : memref<8x8x2xi32, #tpu.memory_space<vmem>>, vector<1x8x2xi32>
    %507 = vector.shape_cast %506 : vector<1x8x2xi32> to vector<8x2xi32>
    %508 = vector.shape_cast %504 : vector<8x2xi32> to vector<1x8x2xi32>
    tpu.vector_store %arg4[%505, %c0_231, %c0_232], %508 {strides = array<i32>} : memref<8x8x2xi32, #tpu.memory_space<vmem>>, vector<1x8x2xi32>,
    %509 = arith.index_cast %c6_i32_198 : i32 to index
    %c0_233 = arith.constant 0 : index
    %c0_234 = arith.constant 0 : index
    %510 = vector.load %arg1[%509, %c0_233, %c0_234] : memref<8x8x2xf32, #tpu.memory_space<vmem>>, vector<1x8x2xf32>
    %511 = vector.shape_cast %510 : vector<1x8x2xf32> to vector<8x2xf32>
    %512 = arith.addf %503, %511 : vector<8x2xf32>
    %c7_i32_235 = arith.constant 7 : i32
    %513 = vector.extract_strided_slice %512 {offsets = [0, 0], sizes = [1, 2], strides = [1, 1]} : vector<8x2xf32> to vector<1x2xf32>
    %c0_236 = arith.constant 0 : index
    %c0_237 = arith.constant 0 : index
    %c0_238 = arith.constant 0 : index
    %514 = vector.load %arg5[%c0_236, %c0_237, %c0_238] : memref<8x8x2xf32, #tpu.memory_space<vmem>>, vector<1x8x2xf32>
    %515 = vector.shape_cast %514 : vector<1x8x2xf32> to vector<8x2xf32>
    %516 = vector.broadcast %513 : vector<1x2xf32> to vector<8x2xf32>
    %517 = arith.addf %516, %515 : vector<8x2xf32>
    %518 = vector.extract_strided_slice %512 {offsets = [1, 0], sizes = [1, 2], strides = [1, 1]} : vector<8x2xf32> to vector<1x2xf32>
    %c1_239 = arith.constant 1 : index
    %c0_240 = arith.constant 0 : index
    %c0_241 = arith.constant 0 : index
    %519 = vector.load %arg5[%c1_239, %c0_240, %c0_241] : memref<8x8x2xf32, #tpu.memory_space<vmem>>, vector<1x8x2xf32>
    %520 = vector.shape_cast %519 : vector<1x8x2xf32> to vector<8x2xf32>
    %521 = vector.broadcast %518 : vector<1x2xf32> to vector<8x2xf32>
    %522 = arith.addf %521, %520 : vector<8x2xf32>
    %523 = vector.extract_strided_slice %512 {offsets = [2, 0], sizes = [1, 2], strides = [1, 1]} : vector<8x2xf32> to vector<1x2xf32>
    %c2_242 = arith.constant 2 : index
    %c0_243 = arith.constant 0 : index
    %c0_244 = arith.constant 0 : index
    %524 = vector.load %arg5[%c2_242, %c0_243, %c0_244] : memref<8x8x2xf32, #tpu.memory_space<vmem>>, vector<1x8x2xf32>
    %525 = vector.shape_cast %524 : vector<1x8x2xf32> to vector<8x2xf32>
    %526 = vector.broadcast %523 : vector<1x2xf32> to vector<8x2xf32>
    %527 = arith.addf %526, %525 : vector<8x2xf32>
    %528 = vector.extract_strided_slice %512 {offsets = [3, 0], sizes = [1, 2], strides = [1, 1]} : vector<8x2xf32> to vector<1x2xf32>
    %c3_245 = arith.constant 3 : index
    %c0_246 = arith.constant 0 : index
    %c0_247 = arith.constant 0 : index
    %529 = vector.load %arg5[%c3_245, %c0_246, %c0_247] : memref<8x8x2xf32, #tpu.memory_space<vmem>>, vector<1x8x2xf32>
    %530 = vector.shape_cast %529 : vector<1x8x2xf32> to vector<8x2xf32>
    %531 = vector.broadcast %528 : vector<1x2xf32> to vector<8x2xf32>
    %532 = arith.addf %531, %530 : vector<8x2xf32>
    %533 = vector.extract_strided_slice %512 {offsets = [4, 0], sizes = [1, 2], strides = [1, 1]} : vector<8x2xf32> to vector<1x2xf32>
    %c4_248 = arith.constant 4 : index
    %c0_249 = arith.constant 0 : index
    %c0_250 = arith.constant 0 : index
    %534 = vector.load %arg5[%c4_248, %c0_249, %c0_250] : memref<8x8x2xf32, #tpu.memory_space<vmem>>, vector<1x8x2xf32>
    %535 = vector.shape_cast %534 : vector<1x8x2xf32> to vector<8x2xf32>
    %536 = vector.broadcast %533 : vector<1x2xf32> to vector<8x2xf32>
    %537 = arith.addf %536, %535 : vector<8x2xf32>
    %538 = vector.extract_strided_slice %512 {offsets = [5, 0], sizes = [1, 2], strides = [1, 1]} : vector<8x2xf32> to vector<1x2xf32>
    %c5_251 = arith.constant 5 : index
    %c0_252 = arith.constant 0 : index
    %c0_253 = arith.constant 0 : index
    %539 = vector.load %arg5[%c5_251, %c0_252, %c0_253] : memref<8x8x2xf32, #tpu.memory_space<vmem>>, vector<1x8x2xf32>
    %540 = vector.shape_cast %539 : vector<1x8x2xf32> to vector<8x2xf32>
    %541 = vector.broadcast %538 : vector<1x2xf32> to vector<8x2xf32>
    %542 = arith.addf %541, %540 : vector<8x2xf32>
    %543 = vector.extract_strided_slice %512 {offsets = [6, 0], sizes = [1, 2], strides = [1, 1]} : vector<8x2xf32> to vector<1x2xf32>
    %c6_254 = arith.constant 6 : index
    %c0_255 = arith.constant 0 : index
    %c0_256 = arith.constant 0 : index
    %544 = vector.load %arg5[%c6_254, %c0_255, %c0_256] : memref<8x8x2xf32, #tpu.memory_space<vmem>>, vector<1x8x2xf32>
    %545 = vector.shape_cast %544 : vector<1x8x2xf32> to vector<8x2xf32>
    %546 = vector.broadcast %543 : vector<1x2xf32> to vector<8x2xf32>
    %547 = arith.addf %546, %545 : vector<8x2xf32>
    %548 = vector.extract_strided_slice %512 {offsets = [7, 0], sizes = [1, 2], strides = [1, 1]} : vector<8x2xf32> to vector<1x2xf32>
    %c7_257 = arith.constant 7 : index
    %c0_258 = arith.constant 0 : index
    %c0_259 = arith.constant 0 : index
    %549 = vector.load %arg5[%c7_257, %c0_258, %c0_259] : memref<8x8x2xf32, #tpu.memory_space<vmem>>, vector<1x8x2xf32>
    %550 = vector.shape_cast %549 : vector<1x8x2xf32> to vector<8x2xf32>
    %551 = vector.broadcast %548 : vector<1x2xf32> to vector<8x2xf32>
    %552 = arith.addf %551, %550 : vector<8x2xf32>
    %553 = arith.cmpf ogt, %522, %517 : vector<8x2xf32>
    %554 = arith.maximumf %517, %522 : vector<8x2xf32>
    %c1_i32_260 = arith.constant 1 : i32
    %c0_i32_261 = arith.constant 0 : i32
    %555 = vector.broadcast %c1_i32_260 : i32 to vector<8x2xi32>
    %556 = vector.broadcast %c0_i32_261 : i32 to vector<8x2xi32>
    %557 = arith.select %553, %555, %556 : vector<8x2xi1>, vector<8x2xi32>
    %558 = arith.cmpf ogt, %532, %527 : vector<8x2xf32>
    %559 = arith.maximumf %527, %532 : vector<8x2xf32>
    %c3_i32_262 = arith.constant 3 : i32
    %c2_i32_263 = arith.constant 2 : i32
    %560 = vector.broadcast %c3_i32_262 : i32 to vector<8x2xi32>
    %561 = vector.broadcast %c2_i32_263 : i32 to vector<8x2xi32>
    %562 = arith.select %558, %560, %561 : vector<8x2xi1>, vector<8x2xi32>
    %563 = arith.cmpf ogt, %542, %537 : vector<8x2xf32>
    %564 = arith.maximumf %537, %542 : vector<8x2xf32>
    %c5_i32_264 = arith.constant 5 : i32
    %c4_i32_265 = arith.constant 4 : i32
    %565 = vector.broadcast %c5_i32_264 : i32 to vector<8x2xi32>
    %566 = vector.broadcast %c4_i32_265 : i32 to vector<8x2xi32>
    %567 = arith.select %563, %565, %566 : vector<8x2xi1>, vector<8x2xi32>
    %568 = arith.cmpf ogt, %552, %547 : vector<8x2xf32>
    %569 = arith.maximumf %547, %552 : vector<8x2xf32>
    %c7_i32_266 = arith.constant 7 : i32
    %c6_i32_267 = arith.constant 6 : i32
    %570 = vector.broadcast %c7_i32_266 : i32 to vector<8x2xi32>
    %571 = vector.broadcast %c6_i32_267 : i32 to vector<8x2xi32>
    %572 = arith.select %568, %570, %571 : vector<8x2xi1>, vector<8x2xi32>
    %573 = arith.cmpf ogt, %559, %554 : vector<8x2xf32>
    %574 = arith.maximumf %554, %559 : vector<8x2xf32>
    %575 = arith.select %573, %562, %557 : vector<8x2xi1>, vector<8x2xi32>
    %576 = arith.cmpf ogt, %569, %564 : vector<8x2xf32>
    %577 = arith.maximumf %564, %569 : vector<8x2xf32>
    %578 = arith.select %576, %572, %567 : vector<8x2xi1>, vector<8x2xi32>
    %579 = arith.cmpf ogt, %577, %574 : vector<8x2xf32>
    %580 = arith.maximumf %574, %577 : vector<8x2xf32>
    %581 = arith.select %579, %578, %575 : vector<8x2xi1>, vector<8x2xi32>
    %582 = arith.index_cast %c7_i32_235 : i32 to index
    %c0_268 = arith.constant 0 : index
    %c0_269 = arith.constant 0 : index
    %583 = vector.load %arg4[%582, %c0_268, %c0_269] : memref<8x8x2xi32, #tpu.memory_space<vmem>>, vector<1x8x2xi32>
    %584 = vector.shape_cast %583 : vector<1x8x2xi32> to vector<8x2xi32>
    %585 = vector.shape_cast %581 : vector<8x2xi32> to vector<1x8x2xi32>
    tpu.vector_store %arg4[%582, %c0_268, %c0_269], %585 {strides = array<i32>} : memref<8x8x2xi32, #tpu.memory_space<vmem>>, vector<1x8x2xi32>,
    %586 = arith.index_cast %c7_i32_235 : i32 to index
    %c0_270 = arith.constant 0 : index
    %c0_271 = arith.constant 0 : index
    %587 = vector.load %arg1[%586, %c0_270, %c0_271] : memref<8x8x2xf32, #tpu.memory_space<vmem>>, vector<1x8x2xf32>
    %588 = vector.shape_cast %587 : vector<1x8x2xf32> to vector<8x2xf32>
    %589 = arith.addf %580, %588 : vector<8x2xf32>
    %c7_i32_272 = arith.constant 7 : i32
    %590 = vector.extract_strided_slice %589 {offsets = [0, 0], sizes = [1, 2], strides = [1, 1]} : vector<8x2xf32> to vector<1x2xf32>
    %591 = vector.extract_strided_slice %589 {offsets = [1, 0], sizes = [1, 2], strides = [1, 1]} : vector<8x2xf32> to vector<1x2xf32>
    %592 = vector.extract_strided_slice %589 {offsets = [2, 0], sizes = [1, 2], strides = [1, 1]} : vector<8x2xf32> to vector<1x2xf32>
    %593 = vector.extract_strided_slice %589 {offsets = [3, 0], sizes = [1, 2], strides = [1, 1]} : vector<8x2xf32> to vector<1x2xf32>
    %594 = vector.extract_strided_slice %589 {offsets = [4, 0], sizes = [1, 2], strides = [1, 1]} : vector<8x2xf32> to vector<1x2xf32>
    %595 = vector.extract_strided_slice %589 {offsets = [5, 0], sizes = [1, 2], strides = [1, 1]} : vector<8x2xf32> to vector<1x2xf32>
    %596 = vector.extract_strided_slice %589 {offsets = [6, 0], sizes = [1, 2], strides = [1, 1]} : vector<8x2xf32> to vector<1x2xf32>
    %597 = vector.extract_strided_slice %589 {offsets = [7, 0], sizes = [1, 2], strides = [1, 1]} : vector<8x2xf32> to vector<1x2xf32>
    %598 = arith.cmpf ogt, %591, %590 : vector<1x2xf32>
    %599 = arith.maximumf %590, %591 : vector<1x2xf32>
    %c1_i32_273 = arith.constant 1 : i32
    %c0_i32_274 = arith.constant 0 : i32
    %600 = vector.broadcast %c1_i32_273 : i32 to vector<1x2xi32>
    %601 = vector.broadcast %c0_i32_274 : i32 to vector<1x2xi32>
    %602 = arith.select %598, %600, %601 : vector<1x2xi1>, vector<1x2xi32>
    %603 = arith.cmpf ogt, %593, %592 : vector<1x2xf32>
    %604 = arith.maximumf %592, %593 : vector<1x2xf32>
    %c3_i32_275 = arith.constant 3 : i32
    %c2_i32_276 = arith.constant 2 : i32
    %605 = vector.broadcast %c3_i32_275 : i32 to vector<1x2xi32>
    %606 = vector.broadcast %c2_i32_276 : i32 to vector<1x2xi32>
    %607 = arith.select %603, %605, %606 : vector<1x2xi1>, vector<1x2xi32>
    %608 = arith.cmpf ogt, %595, %594 : vector<1x2xf32>
    %609 = arith.maximumf %594, %595 : vector<1x2xf32>
    %c5_i32_277 = arith.constant 5 : i32
    %c4_i32_278 = arith.constant 4 : i32
    %610 = vector.broadcast %c5_i32_277 : i32 to vector<1x2xi32>
    %611 = vector.broadcast %c4_i32_278 : i32 to vector<1x2xi32>
    %612 = arith.select %608, %610, %611 : vector<1x2xi1>, vector<1x2xi32>
    %613 = arith.cmpf ogt, %597, %596 : vector<1x2xf32>
    %614 = arith.maximumf %596, %597 : vector<1x2xf32>
    %c7_i32_279 = arith.constant 7 : i32
    %c6_i32_280 = arith.constant 6 : i32
    %615 = vector.broadcast %c7_i32_279 : i32 to vector<1x2xi32>
    %616 = vector.broadcast %c6_i32_280 : i32 to vector<1x2xi32>
    %617 = arith.select %613, %615, %616 : vector<1x2xi1>, vector<1x2xi32>
    %618 = arith.cmpf ogt, %604, %599 : vector<1x2xf32>
    %619 = arith.maximumf %599, %604 : vector<1x2xf32>
    %620 = arith.select %618, %607, %602 : vector<1x2xi1>, vector<1x2xi32>
    %621 = arith.cmpf ogt, %614, %609 : vector<1x2xf32>
    %622 = arith.maximumf %609, %614 : vector<1x2xf32>
    %623 = arith.select %621, %617, %612 : vector<1x2xi1>, vector<1x2xi32>
    %624 = arith.cmpf ogt, %622, %619 : vector<1x2xf32>
    %625 = arith.select %624, %623, %620 : vector<1x2xi1>, vector<1x2xi32>
    %626 = tpu.iota {dimensions = array<i32: 0>} : vector<8x2xi32>
    %c7_281 = arith.constant 7 : index
    %c0_282 = arith.constant 0 : index
    %c0_283 = arith.constant 0 : index
    %627 = vector.load %arg4[%c7_281, %c0_282, %c0_283] : memref<8x8x2xi32, #tpu.memory_space<vmem>>, vector<1x8x2xi32>
    %628 = vector.shape_cast %627 : vector<1x8x2xi32> to vector<8x2xi32>
    %629 = vector.extract_strided_slice %628 {offsets = [0, 0], sizes = [1, 2], strides = [1, 1]} : vector<8x2xi32> to vector<1x2xi32>
    %630 = vector.extract_strided_slice %628 {offsets = [1, 0], sizes = [1, 2], strides = [1, 1]} : vector<8x2xi32> to vector<1x2xi32>
    %631 = vector.extract_strided_slice %628 {offsets = [2, 0], sizes = [1, 2], strides = [1, 1]} : vector<8x2xi32> to vector<1x2xi32>
    %632 = vector.extract_strided_slice %628 {offsets = [3, 0], sizes = [1, 2], strides = [1, 1]} : vector<8x2xi32> to vector<1x2xi32>
    %633 = vector.extract_strided_slice %628 {offsets = [4, 0], sizes = [1, 2], strides = [1, 1]} : vector<8x2xi32> to vector<1x2xi32>
    %634 = vector.extract_strided_slice %628 {offsets = [5, 0], sizes = [1, 2], strides = [1, 1]} : vector<8x2xi32> to vector<1x2xi32>
    %635 = vector.extract_strided_slice %628 {offsets = [6, 0], sizes = [1, 2], strides = [1, 1]} : vector<8x2xi32> to vector<1x2xi32>
    %636 = vector.extract_strided_slice %628 {offsets = [7, 0], sizes = [1, 2], strides = [1, 1]} : vector<8x2xi32> to vector<1x2xi32>
    %c0_i32_284 = arith.constant 0 : i32
    %637 = vector.broadcast %c0_i32_284 : i32 to vector<1x2xi32>
    %638 = arith.shrsi %625, %637 : vector<1x2xi32>
    %c1_i32_285 = arith.constant 1 : i32
    %639 = vector.broadcast %c1_i32_285 : i32 to vector<1x2xi32>
    %640 = arith.andi %638, %639 : vector<1x2xi32>
    %c1_i32_286 = arith.constant 1 : i32
    %641 = vector.broadcast %c1_i32_286 : i32 to vector<1x2xi32>
    %642 = arith.cmpi eq, %640, %641 : vector<1x2xi32>
    %643 = arith.select %642, %630, %629 : vector<1x2xi1>, vector<1x2xi32>
    %644 = arith.select %642, %632, %631 : vector<1x2xi1>, vector<1x2xi32>
    %645 = arith.select %642, %634, %633 : vector<1x2xi1>, vector<1x2xi32>
    %646 = arith.select %642, %636, %635 : vector<1x2xi1>, vector<1x2xi32>
    %c1_i32_287 = arith.constant 1 : i32
    %647 = vector.broadcast %c1_i32_287 : i32 to vector<1x2xi32>
    %648 = arith.shrsi %625, %647 : vector<1x2xi32>
    %c1_i32_288 = arith.constant 1 : i32
    %649 = vector.broadcast %c1_i32_288 : i32 to vector<1x2xi32>
    %650 = arith.andi %648, %649 : vector<1x2xi32>
    %c1_i32_289 = arith.constant 1 : i32
    %651 = vector.broadcast %c1_i32_289 : i32 to vector<1x2xi32>
    %652 = arith.cmpi eq, %650, %651 : vector<1x2xi32>
    %653 = arith.select %652, %644, %643 : vector<1x2xi1>, vector<1x2xi32>
    %654 = arith.select %652, %646, %645 : vector<1x2xi1>, vector<1x2xi32>
    %c2_i32_290 = arith.constant 2 : i32
    %655 = vector.broadcast %c2_i32_290 : i32 to vector<1x2xi32>
    %656 = arith.shrsi %625, %655 : vector<1x2xi32>
    %c1_i32_291 = arith.constant 1 : i32
    %657 = vector.broadcast %c1_i32_291 : i32 to vector<1x2xi32>
    %658 = arith.andi %656, %657 : vector<1x2xi32>
    %c1_i32_292 = arith.constant 1 : i32
    %659 = vector.broadcast %c1_i32_292 : i32 to vector<1x2xi32>
    %660 = arith.cmpi eq, %658, %659 : vector<1x2xi32>
    %661 = arith.select %660, %654, %653 : vector<1x2xi1>, vector<1x2xi32>
    %c6_293 = arith.constant 6 : index
    %c0_294 = arith.constant 0 : index
    %c0_295 = arith.constant 0 : index
    %662 = vector.load %arg4[%c6_293, %c0_294, %c0_295] : memref<8x8x2xi32, #tpu.memory_space<vmem>>, vector<1x8x2xi32>
    %663 = vector.shape_cast %662 : vector<1x8x2xi32> to vector<8x2xi32>
    %664 = vector.extract_strided_slice %663 {offsets = [0, 0], sizes = [1, 2], strides = [1, 1]} : vector<8x2xi32> to vector<1x2xi32>
    %665 = vector.extract_strided_slice %663 {offsets = [1, 0], sizes = [1, 2], strides = [1, 1]} : vector<8x2xi32> to vector<1x2xi32>
    %666 = vector.extract_strided_slice %663 {offsets = [2, 0], sizes = [1, 2], strides = [1, 1]} : vector<8x2xi32> to vector<1x2xi32>
    %667 = vector.extract_strided_slice %663 {offsets = [3, 0], sizes = [1, 2], strides = [1, 1]} : vector<8x2xi32> to vector<1x2xi32>
    %668 = vector.extract_strided_slice %663 {offsets = [4, 0], sizes = [1, 2], strides = [1, 1]} : vector<8x2xi32> to vector<1x2xi32>
    %669 = vector.extract_strided_slice %663 {offsets = [5, 0], sizes = [1, 2], strides = [1, 1]} : vector<8x2xi32> to vector<1x2xi32>
    %670 = vector.extract_strided_slice %663 {offsets = [6, 0], sizes = [1, 2], strides = [1, 1]} : vector<8x2xi32> to vector<1x2xi32>
    %671 = vector.extract_strided_slice %663 {offsets = [7, 0], sizes = [1, 2], strides = [1, 1]} : vector<8x2xi32> to vector<1x2xi32>
    %c0_i32_296 = arith.constant 0 : i32
    %672 = vector.broadcast %c0_i32_296 : i32 to vector<1x2xi32>
    %673 = arith.shrsi %661, %672 : vector<1x2xi32>
    %c1_i32_297 = arith.constant 1 : i32
    %674 = vector.broadcast %c1_i32_297 : i32 to vector<1x2xi32>
    %675 = arith.andi %673, %674 : vector<1x2xi32>
    %c1_i32_298 = arith.constant 1 : i32
    %676 = vector.broadcast %c1_i32_298 : i32 to vector<1x2xi32>
    %677 = arith.cmpi eq, %675, %676 : vector<1x2xi32>
    %678 = arith.select %677, %665, %664 : vector<1x2xi1>, vector<1x2xi32>
    %679 = arith.select %677, %667, %666 : vector<1x2xi1>, vector<1x2xi32>
    %680 = arith.select %677, %669, %668 : vector<1x2xi1>, vector<1x2xi32>
    %681 = arith.select %677, %671, %670 : vector<1x2xi1>, vector<1x2xi32>
    %c1_i32_299 = arith.constant 1 : i32
    %682 = vector.broadcast %c1_i32_299 : i32 to vector<1x2xi32>
    %683 = arith.shrsi %661, %682 : vector<1x2xi32>
    %c1_i32_300 = arith.constant 1 : i32
    %684 = vector.broadcast %c1_i32_300 : i32 to vector<1x2xi32>
    %685 = arith.andi %683, %684 : vector<1x2xi32>
    %c1_i32_301 = arith.constant 1 : i32
    %686 = vector.broadcast %c1_i32_301 : i32 to vector<1x2xi32>
    %687 = arith.cmpi eq, %685, %686 : vector<1x2xi32>
    %688 = arith.select %687, %679, %678 : vector<1x2xi1>, vector<1x2xi32>
    %689 = arith.select %687, %681, %680 : vector<1x2xi1>, vector<1x2xi32>
    %c2_i32_302 = arith.constant 2 : i32
    %690 = vector.broadcast %c2_i32_302 : i32 to vector<1x2xi32>
    %691 = arith.shrsi %661, %690 : vector<1x2xi32>
    %c1_i32_303 = arith.constant 1 : i32
    %692 = vector.broadcast %c1_i32_303 : i32 to vector<1x2xi32>
    %693 = arith.andi %691, %692 : vector<1x2xi32>
    %c1_i32_304 = arith.constant 1 : i32
    %694 = vector.broadcast %c1_i32_304 : i32 to vector<1x2xi32>
    %695 = arith.cmpi eq, %693, %694 : vector<1x2xi32>
    %696 = arith.select %695, %689, %688 : vector<1x2xi1>, vector<1x2xi32>
    %c5_305 = arith.constant 5 : index
    %c0_306 = arith.constant 0 : index
    %c0_307 = arith.constant 0 : index
    %697 = vector.load %arg4[%c5_305, %c0_306, %c0_307] : memref<8x8x2xi32, #tpu.memory_space<vmem>>, vector<1x8x2xi32>
    %698 = vector.shape_cast %697 : vector<1x8x2xi32> to vector<8x2xi32>
    %699 = vector.extract_strided_slice %698 {offsets = [0, 0], sizes = [1, 2], strides = [1, 1]} : vector<8x2xi32> to vector<1x2xi32>
    %700 = vector.extract_strided_slice %698 {offsets = [1, 0], sizes = [1, 2], strides = [1, 1]} : vector<8x2xi32> to vector<1x2xi32>
    %701 = vector.extract_strided_slice %698 {offsets = [2, 0], sizes = [1, 2], strides = [1, 1]} : vector<8x2xi32> to vector<1x2xi32>
    %702 = vector.extract_strided_slice %698 {offsets = [3, 0], sizes = [1, 2], strides = [1, 1]} : vector<8x2xi32> to vector<1x2xi32>
    %703 = vector.extract_strided_slice %698 {offsets = [4, 0], sizes = [1, 2], strides = [1, 1]} : vector<8x2xi32> to vector<1x2xi32>
    %704 = vector.extract_strided_slice %698 {offsets = [5, 0], sizes = [1, 2], strides = [1, 1]} : vector<8x2xi32> to vector<1x2xi32>
    %705 = vector.extract_strided_slice %698 {offsets = [6, 0], sizes = [1, 2], strides = [1, 1]} : vector<8x2xi32> to vector<1x2xi32>
    %706 = vector.extract_strided_slice %698 {offsets = [7, 0], sizes = [1, 2], strides = [1, 1]} : vector<8x2xi32> to vector<1x2xi32>
    %c0_i32_308 = arith.constant 0 : i32
    %707 = vector.broadcast %c0_i32_308 : i32 to vector<1x2xi32>
    %708 = arith.shrsi %696, %707 : vector<1x2xi32>
    %c1_i32_309 = arith.constant 1 : i32
    %709 = vector.broadcast %c1_i32_309 : i32 to vector<1x2xi32>
    %710 = arith.andi %708, %709 : vector<1x2xi32>
    %c1_i32_310 = arith.constant 1 : i32
    %711 = vector.broadcast %c1_i32_310 : i32 to vector<1x2xi32>
    %712 = arith.cmpi eq, %710, %711 : vector<1x2xi32>
    %713 = arith.select %712, %700, %699 : vector<1x2xi1>, vector<1x2xi32>
    %714 = arith.select %712, %702, %701 : vector<1x2xi1>, vector<1x2xi32>
    %715 = arith.select %712, %704, %703 : vector<1x2xi1>, vector<1x2xi32>
    %716 = arith.select %712, %706, %705 : vector<1x2xi1>, vector<1x2xi32>
    %c1_i32_311 = arith.constant 1 : i32
    %717 = vector.broadcast %c1_i32_311 : i32 to vector<1x2xi32>
    %718 = arith.shrsi %696, %717 : vector<1x2xi32>
    %c1_i32_312 = arith.constant 1 : i32
    %719 = vector.broadcast %c1_i32_312 : i32 to vector<1x2xi32>
    %720 = arith.andi %718, %719 : vector<1x2xi32>
    %c1_i32_313 = arith.constant 1 : i32
    %721 = vector.broadcast %c1_i32_313 : i32 to vector<1x2xi32>
    %722 = arith.cmpi eq, %720, %721 : vector<1x2xi32>
    %723 = arith.select %722, %714, %713 : vector<1x2xi1>, vector<1x2xi32>
    %724 = arith.select %722, %716, %715 : vector<1x2xi1>, vector<1x2xi32>
    %c2_i32_314 = arith.constant 2 : i32
    %725 = vector.broadcast %c2_i32_314 : i32 to vector<1x2xi32>
    %726 = arith.shrsi %696, %725 : vector<1x2xi32>
    %c1_i32_315 = arith.constant 1 : i32
    %727 = vector.broadcast %c1_i32_315 : i32 to vector<1x2xi32>
    %728 = arith.andi %726, %727 : vector<1x2xi32>
    %c1_i32_316 = arith.constant 1 : i32
    %729 = vector.broadcast %c1_i32_316 : i32 to vector<1x2xi32>
    %730 = arith.cmpi eq, %728, %729 : vector<1x2xi32>
    %731 = arith.select %730, %724, %723 : vector<1x2xi1>, vector<1x2xi32>
    %c4_317 = arith.constant 4 : index
    %c0_318 = arith.constant 0 : index
    %c0_319 = arith.constant 0 : index
    %732 = vector.load %arg4[%c4_317, %c0_318, %c0_319] : memref<8x8x2xi32, #tpu.memory_space<vmem>>, vector<1x8x2xi32>
    %733 = vector.shape_cast %732 : vector<1x8x2xi32> to vector<8x2xi32>
    %734 = vector.extract_strided_slice %733 {offsets = [0, 0], sizes = [1, 2], strides = [1, 1]} : vector<8x2xi32> to vector<1x2xi32>
    %735 = vector.extract_strided_slice %733 {offsets = [1, 0], sizes = [1, 2], strides = [1, 1]} : vector<8x2xi32> to vector<1x2xi32>
    %736 = vector.extract_strided_slice %733 {offsets = [2, 0], sizes = [1, 2], strides = [1, 1]} : vector<8x2xi32> to vector<1x2xi32>
    %737 = vector.extract_strided_slice %733 {offsets = [3, 0], sizes = [1, 2], strides = [1, 1]} : vector<8x2xi32> to vector<1x2xi32>
    %738 = vector.extract_strided_slice %733 {offsets = [4, 0], sizes = [1, 2], strides = [1, 1]} : vector<8x2xi32> to vector<1x2xi32>
    %739 = vector.extract_strided_slice %733 {offsets = [5, 0], sizes = [1, 2], strides = [1, 1]} : vector<8x2xi32> to vector<1x2xi32>
    %740 = vector.extract_strided_slice %733 {offsets = [6, 0], sizes = [1, 2], strides = [1, 1]} : vector<8x2xi32> to vector<1x2xi32>
    %741 = vector.extract_strided_slice %733 {offsets = [7, 0], sizes = [1, 2], strides = [1, 1]} : vector<8x2xi32> to vector<1x2xi32>
    %c0_i32_320 = arith.constant 0 : i32
    %742 = vector.broadcast %c0_i32_320 : i32 to vector<1x2xi32>
    %743 = arith.shrsi %731, %742 : vector<1x2xi32>
    %c1_i32_321 = arith.constant 1 : i32
    %744 = vector.broadcast %c1_i32_321 : i32 to vector<1x2xi32>
    %745 = arith.andi %743, %744 : vector<1x2xi32>
    %c1_i32_322 = arith.constant 1 : i32
    %746 = vector.broadcast %c1_i32_322 : i32 to vector<1x2xi32>
    %747 = arith.cmpi eq, %745, %746 : vector<1x2xi32>
    %748 = arith.select %747, %735, %734 : vector<1x2xi1>, vector<1x2xi32>
    %749 = arith.select %747, %737, %736 : vector<1x2xi1>, vector<1x2xi32>
    %750 = arith.select %747, %739, %738 : vector<1x2xi1>, vector<1x2xi32>
    %751 = arith.select %747, %741, %740 : vector<1x2xi1>, vector<1x2xi32>
    %c1_i32_323 = arith.constant 1 : i32
    %752 = vector.broadcast %c1_i32_323 : i32 to vector<1x2xi32>
    %753 = arith.shrsi %731, %752 : vector<1x2xi32>
    %c1_i32_324 = arith.constant 1 : i32
    %754 = vector.broadcast %c1_i32_324 : i32 to vector<1x2xi32>
    %755 = arith.andi %753, %754 : vector<1x2xi32>
    %c1_i32_325 = arith.constant 1 : i32
    %756 = vector.broadcast %c1_i32_325 : i32 to vector<1x2xi32>
    %757 = arith.cmpi eq, %755, %756 : vector<1x2xi32>
    %758 = arith.select %757, %749, %748 : vector<1x2xi1>, vector<1x2xi32>
    %759 = arith.select %757, %751, %750 : vector<1x2xi1>, vector<1x2xi32>
    %c2_i32_326 = arith.constant 2 : i32
    %760 = vector.broadcast %c2_i32_326 : i32 to vector<1x2xi32>
    %761 = arith.shrsi %731, %760 : vector<1x2xi32>
    %c1_i32_327 = arith.constant 1 : i32
    %762 = vector.broadcast %c1_i32_327 : i32 to vector<1x2xi32>
    %763 = arith.andi %761, %762 : vector<1x2xi32>
    %c1_i32_328 = arith.constant 1 : i32
    %764 = vector.broadcast %c1_i32_328 : i32 to vector<1x2xi32>
    %765 = arith.cmpi eq, %763, %764 : vector<1x2xi32>
    %766 = arith.select %765, %759, %758 : vector<1x2xi1>, vector<1x2xi32>
    %c3_329 = arith.constant 3 : index
    %c0_330 = arith.constant 0 : index
    %c0_331 = arith.constant 0 : index
    %767 = vector.load %arg4[%c3_329, %c0_330, %c0_331] : memref<8x8x2xi32, #tpu.memory_space<vmem>>, vector<1x8x2xi32>
    %768 = vector.shape_cast %767 : vector<1x8x2xi32> to vector<8x2xi32>
    %769 = vector.extract_strided_slice %768 {offsets = [0, 0], sizes = [1, 2], strides = [1, 1]} : vector<8x2xi32> to vector<1x2xi32>
    %770 = vector.extract_strided_slice %768 {offsets = [1, 0], sizes = [1, 2], strides = [1, 1]} : vector<8x2xi32> to vector<1x2xi32>
    %771 = vector.extract_strided_slice %768 {offsets = [2, 0], sizes = [1, 2], strides = [1, 1]} : vector<8x2xi32> to vector<1x2xi32>
    %772 = vector.extract_strided_slice %768 {offsets = [3, 0], sizes = [1, 2], strides = [1, 1]} : vector<8x2xi32> to vector<1x2xi32>
    %773 = vector.extract_strided_slice %768 {offsets = [4, 0], sizes = [1, 2], strides = [1, 1]} : vector<8x2xi32> to vector<1x2xi32>
    %774 = vector.extract_strided_slice %768 {offsets = [5, 0], sizes = [1, 2], strides = [1, 1]} : vector<8x2xi32> to vector<1x2xi32>
    %775 = vector.extract_strided_slice %768 {offsets = [6, 0], sizes = [1, 2], strides = [1, 1]} : vector<8x2xi32> to vector<1x2xi32>
    %776 = vector.extract_strided_slice %768 {offsets = [7, 0], sizes = [1, 2], strides = [1, 1]} : vector<8x2xi32> to vector<1x2xi32>
    %c0_i32_332 = arith.constant 0 : i32
    %777 = vector.broadcast %c0_i32_332 : i32 to vector<1x2xi32>
    %778 = arith.shrsi %766, %777 : vector<1x2xi32>
    %c1_i32_333 = arith.constant 1 : i32
    %779 = vector.broadcast %c1_i32_333 : i32 to vector<1x2xi32>
    %780 = arith.andi %778, %779 : vector<1x2xi32>
    %c1_i32_334 = arith.constant 1 : i32
    %781 = vector.broadcast %c1_i32_334 : i32 to vector<1x2xi32>
    %782 = arith.cmpi eq, %780, %781 : vector<1x2xi32>
    %783 = arith.select %782, %770, %769 : vector<1x2xi1>, vector<1x2xi32>
    %784 = arith.select %782, %772, %771 : vector<1x2xi1>, vector<1x2xi32>
    %785 = arith.select %782, %774, %773 : vector<1x2xi1>, vector<1x2xi32>
    %786 = arith.select %782, %776, %775 : vector<1x2xi1>, vector<1x2xi32>
    %c1_i32_335 = arith.constant 1 : i32
    %787 = vector.broadcast %c1_i32_335 : i32 to vector<1x2xi32>
    %788 = arith.shrsi %766, %787 : vector<1x2xi32>
    %c1_i32_336 = arith.constant 1 : i32
    %789 = vector.broadcast %c1_i32_336 : i32 to vector<1x2xi32>
    %790 = arith.andi %788, %789 : vector<1x2xi32>
    %c1_i32_337 = arith.constant 1 : i32
    %791 = vector.broadcast %c1_i32_337 : i32 to vector<1x2xi32>
    %792 = arith.cmpi eq, %790, %791 : vector<1x2xi32>
    %793 = arith.select %792, %784, %783 : vector<1x2xi1>, vector<1x2xi32>
    %794 = arith.select %792, %786, %785 : vector<1x2xi1>, vector<1x2xi32>
    %c2_i32_338 = arith.constant 2 : i32
    %795 = vector.broadcast %c2_i32_338 : i32 to vector<1x2xi32>
    %796 = arith.shrsi %766, %795 : vector<1x2xi32>
    %c1_i32_339 = arith.constant 1 : i32
    %797 = vector.broadcast %c1_i32_339 : i32 to vector<1x2xi32>
    %798 = arith.andi %796, %797 : vector<1x2xi32>
    %c1_i32_340 = arith.constant 1 : i32
    %799 = vector.broadcast %c1_i32_340 : i32 to vector<1x2xi32>
    %800 = arith.cmpi eq, %798, %799 : vector<1x2xi32>
    %801 = arith.select %800, %794, %793 : vector<1x2xi1>, vector<1x2xi32>
    %c2_341 = arith.constant 2 : index
    %c0_342 = arith.constant 0 : index
    %c0_343 = arith.constant 0 : index
    %802 = vector.load %arg4[%c2_341, %c0_342, %c0_343] : memref<8x8x2xi32, #tpu.memory_space<vmem>>, vector<1x8x2xi32>
    %803 = vector.shape_cast %802 : vector<1x8x2xi32> to vector<8x2xi32>
    %804 = vector.extract_strided_slice %803 {offsets = [0, 0], sizes = [1, 2], strides = [1, 1]} : vector<8x2xi32> to vector<1x2xi32>
    %805 = vector.extract_strided_slice %803 {offsets = [1, 0], sizes = [1, 2], strides = [1, 1]} : vector<8x2xi32> to vector<1x2xi32>
    %806 = vector.extract_strided_slice %803 {offsets = [2, 0], sizes = [1, 2], strides = [1, 1]} : vector<8x2xi32> to vector<1x2xi32>
    %807 = vector.extract_strided_slice %803 {offsets = [3, 0], sizes = [1, 2], strides = [1, 1]} : vector<8x2xi32> to vector<1x2xi32>
    %808 = vector.extract_strided_slice %803 {offsets = [4, 0], sizes = [1, 2], strides = [1, 1]} : vector<8x2xi32> to vector<1x2xi32>
    %809 = vector.extract_strided_slice %803 {offsets = [5, 0], sizes = [1, 2], strides = [1, 1]} : vector<8x2xi32> to vector<1x2xi32>
    %810 = vector.extract_strided_slice %803 {offsets = [6, 0], sizes = [1, 2], strides = [1, 1]} : vector<8x2xi32> to vector<1x2xi32>
    %811 = vector.extract_strided_slice %803 {offsets = [7, 0], sizes = [1, 2], strides = [1, 1]} : vector<8x2xi32> to vector<1x2xi32>
    %c0_i32_344 = arith.constant 0 : i32
    %812 = vector.broadcast %c0_i32_344 : i32 to vector<1x2xi32>
    %813 = arith.shrsi %801, %812 : vector<1x2xi32>
    %c1_i32_345 = arith.constant 1 : i32
    %814 = vector.broadcast %c1_i32_345 : i32 to vector<1x2xi32>
    %815 = arith.andi %813, %814 : vector<1x2xi32>
    %c1_i32_346 = arith.constant 1 : i32
    %816 = vector.broadcast %c1_i32_346 : i32 to vector<1x2xi32>
    %817 = arith.cmpi eq, %815, %816 : vector<1x2xi32>
    %818 = arith.select %817, %805, %804 : vector<1x2xi1>, vector<1x2xi32>
    %819 = arith.select %817, %807, %806 : vector<1x2xi1>, vector<1x2xi32>
    %820 = arith.select %817, %809, %808 : vector<1x2xi1>, vector<1x2xi32>
    %821 = arith.select %817, %811, %810 : vector<1x2xi1>, vector<1x2xi32>
    %c1_i32_347 = arith.constant 1 : i32
    %822 = vector.broadcast %c1_i32_347 : i32 to vector<1x2xi32>
    %823 = arith.shrsi %801, %822 : vector<1x2xi32>
    %c1_i32_348 = arith.constant 1 : i32
    %824 = vector.broadcast %c1_i32_348 : i32 to vector<1x2xi32>
    %825 = arith.andi %823, %824 : vector<1x2xi32>
    %c1_i32_349 = arith.constant 1 : i32
    %826 = vector.broadcast %c1_i32_349 : i32 to vector<1x2xi32>
    %827 = arith.cmpi eq, %825, %826 : vector<1x2xi32>
    %828 = arith.select %827, %819, %818 : vector<1x2xi1>, vector<1x2xi32>
    %829 = arith.select %827, %821, %820 : vector<1x2xi1>, vector<1x2xi32>
    %c2_i32_350 = arith.constant 2 : i32
    %830 = vector.broadcast %c2_i32_350 : i32 to vector<1x2xi32>
    %831 = arith.shrsi %801, %830 : vector<1x2xi32>
    %c1_i32_351 = arith.constant 1 : i32
    %832 = vector.broadcast %c1_i32_351 : i32 to vector<1x2xi32>
    %833 = arith.andi %831, %832 : vector<1x2xi32>
    %c1_i32_352 = arith.constant 1 : i32
    %834 = vector.broadcast %c1_i32_352 : i32 to vector<1x2xi32>
    %835 = arith.cmpi eq, %833, %834 : vector<1x2xi32>
    %836 = arith.select %835, %829, %828 : vector<1x2xi1>, vector<1x2xi32>
    %c1_353 = arith.constant 1 : index
    %c0_354 = arith.constant 0 : index
    %c0_355 = arith.constant 0 : index
    %837 = vector.load %arg4[%c1_353, %c0_354, %c0_355] : memref<8x8x2xi32, #tpu.memory_space<vmem>>, vector<1x8x2xi32>
    %838 = vector.shape_cast %837 : vector<1x8x2xi32> to vector<8x2xi32>
    %839 = vector.extract_strided_slice %838 {offsets = [0, 0], sizes = [1, 2], strides = [1, 1]} : vector<8x2xi32> to vector<1x2xi32>
    %840 = vector.extract_strided_slice %838 {offsets = [1, 0], sizes = [1, 2], strides = [1, 1]} : vector<8x2xi32> to vector<1x2xi32>
    %841 = vector.extract_strided_slice %838 {offsets = [2, 0], sizes = [1, 2], strides = [1, 1]} : vector<8x2xi32> to vector<1x2xi32>
    %842 = vector.extract_strided_slice %838 {offsets = [3, 0], sizes = [1, 2], strides = [1, 1]} : vector<8x2xi32> to vector<1x2xi32>
    %843 = vector.extract_strided_slice %838 {offsets = [4, 0], sizes = [1, 2], strides = [1, 1]} : vector<8x2xi32> to vector<1x2xi32>
    %844 = vector.extract_strided_slice %838 {offsets = [5, 0], sizes = [1, 2], strides = [1, 1]} : vector<8x2xi32> to vector<1x2xi32>
    %845 = vector.extract_strided_slice %838 {offsets = [6, 0], sizes = [1, 2], strides = [1, 1]} : vector<8x2xi32> to vector<1x2xi32>
    %846 = vector.extract_strided_slice %838 {offsets = [7, 0], sizes = [1, 2], strides = [1, 1]} : vector<8x2xi32> to vector<1x2xi32>
    %c0_i32_356 = arith.constant 0 : i32
    %847 = vector.broadcast %c0_i32_356 : i32 to vector<1x2xi32>
    %848 = arith.shrsi %836, %847 : vector<1x2xi32>
    %c1_i32_357 = arith.constant 1 : i32
    %849 = vector.broadcast %c1_i32_357 : i32 to vector<1x2xi32>
    %850 = arith.andi %848, %849 : vector<1x2xi32>
    %c1_i32_358 = arith.constant 1 : i32
    %851 = vector.broadcast %c1_i32_358 : i32 to vector<1x2xi32>
    %852 = arith.cmpi eq, %850, %851 : vector<1x2xi32>
    %853 = arith.select %852, %840, %839 : vector<1x2xi1>, vector<1x2xi32>
    %854 = arith.select %852, %842, %841 : vector<1x2xi1>, vector<1x2xi32>
    %855 = arith.select %852, %844, %843 : vector<1x2xi1>, vector<1x2xi32>
    %856 = arith.select %852, %846, %845 : vector<1x2xi1>, vector<1x2xi32>
    %c1_i32_359 = arith.constant 1 : i32
    %857 = vector.broadcast %c1_i32_359 : i32 to vector<1x2xi32>
    %858 = arith.shrsi %836, %857 : vector<1x2xi32>
    %c1_i32_360 = arith.constant 1 : i32
    %859 = vector.broadcast %c1_i32_360 : i32 to vector<1x2xi32>
    %860 = arith.andi %858, %859 : vector<1x2xi32>
    %c1_i32_361 = arith.constant 1 : i32
    %861 = vector.broadcast %c1_i32_361 : i32 to vector<1x2xi32>
    %862 = arith.cmpi eq, %860, %861 : vector<1x2xi32>
    %863 = arith.select %862, %854, %853 : vector<1x2xi1>, vector<1x2xi32>
    %864 = arith.select %862, %856, %855 : vector<1x2xi1>, vector<1x2xi32>
    %c2_i32_362 = arith.constant 2 : i32
    %865 = vector.broadcast %c2_i32_362 : i32 to vector<1x2xi32>
    %866 = arith.shrsi %836, %865 : vector<1x2xi32>
    %c1_i32_363 = arith.constant 1 : i32
    %867 = vector.broadcast %c1_i32_363 : i32 to vector<1x2xi32>
    %868 = arith.andi %866, %867 : vector<1x2xi32>
    %c1_i32_364 = arith.constant 1 : i32
    %869 = vector.broadcast %c1_i32_364 : i32 to vector<1x2xi32>
    %870 = arith.cmpi eq, %868, %869 : vector<1x2xi32>
    %871 = arith.select %870, %864, %863 : vector<1x2xi1>, vector<1x2xi32>
    %c0_i32_365 = arith.constant 0 : i32
    %872 = vector.broadcast %c0_i32_365 : i32 to vector<8x2xi32>
    %c0_i32_366 = arith.constant 0 : i32
    %873 = vector.broadcast %c0_i32_366 : i32 to vector<8x2xi32>
    %874 = arith.cmpi eq, %626, %873 : vector<8x2xi32>
    %875 = vector.shape_cast %871 : vector<1x2xi32> to vector<1x2xi32>
    %876 = vector.broadcast %875 : vector<1x2xi32> to vector<8x2xi32>
    %877 = arith.select %874, %876, %872 : vector<8x2xi1>, vector<8x2xi32>
    %c1_i32_367 = arith.constant 1 : i32
    %878 = vector.broadcast %c1_i32_367 : i32 to vector<8x2xi32>
    %879 = arith.cmpi eq, %626, %878 : vector<8x2xi32>
    %880 = vector.shape_cast %836 : vector<1x2xi32> to vector<1x2xi32>
    %881 = vector.broadcast %880 : vector<1x2xi32> to vector<8x2xi32>
    %882 = arith.select %879, %881, %877 : vector<8x2xi1>, vector<8x2xi32>
    %c2_i32_368 = arith.constant 2 : i32
    %883 = vector.broadcast %c2_i32_368 : i32 to vector<8x2xi32>
    %884 = arith.cmpi eq, %626, %883 : vector<8x2xi32>
    %885 = vector.shape_cast %801 : vector<1x2xi32> to vector<1x2xi32>
    %886 = vector.broadcast %885 : vector<1x2xi32> to vector<8x2xi32>
    %887 = arith.select %884, %886, %882 : vector<8x2xi1>, vector<8x2xi32>
    %c3_i32_369 = arith.constant 3 : i32
    %888 = vector.broadcast %c3_i32_369 : i32 to vector<8x2xi32>
    %889 = arith.cmpi eq, %626, %888 : vector<8x2xi32>
    %890 = vector.shape_cast %766 : vector<1x2xi32> to vector<1x2xi32>
    %891 = vector.broadcast %890 : vector<1x2xi32> to vector<8x2xi32>
    %892 = arith.select %889, %891, %887 : vector<8x2xi1>, vector<8x2xi32>
    %c4_i32_370 = arith.constant 4 : i32
    %893 = vector.broadcast %c4_i32_370 : i32 to vector<8x2xi32>
    %894 = arith.cmpi eq, %626, %893 : vector<8x2xi32>
    %895 = vector.shape_cast %731 : vector<1x2xi32> to vector<1x2xi32>
    %896 = vector.broadcast %895 : vector<1x2xi32> to vector<8x2xi32>
    %897 = arith.select %894, %896, %892 : vector<8x2xi1>, vector<8x2xi32>
    %c5_i32_371 = arith.constant 5 : i32
    %898 = vector.broadcast %c5_i32_371 : i32 to vector<8x2xi32>
    %899 = arith.cmpi eq, %626, %898 : vector<8x2xi32>
    %900 = vector.shape_cast %696 : vector<1x2xi32> to vector<1x2xi32>
    %901 = vector.broadcast %900 : vector<1x2xi32> to vector<8x2xi32>
    %902 = arith.select %899, %901, %897 : vector<8x2xi1>, vector<8x2xi32>
    %c6_i32_372 = arith.constant 6 : i32
    %903 = vector.broadcast %c6_i32_372 : i32 to vector<8x2xi32>
    %904 = arith.cmpi eq, %626, %903 : vector<8x2xi32>
    %905 = vector.shape_cast %661 : vector<1x2xi32> to vector<1x2xi32>
    %906 = vector.broadcast %905 : vector<1x2xi32> to vector<8x2xi32>
    %907 = arith.select %904, %906, %902 : vector<8x2xi1>, vector<8x2xi32>
    %c7_i32_373 = arith.constant 7 : i32
    %908 = vector.broadcast %c7_i32_373 : i32 to vector<8x2xi32>
    %909 = arith.cmpi eq, %626, %908 : vector<8x2xi32>
    %910 = vector.shape_cast %625 : vector<1x2xi32> to vector<1x2xi32>
    %911 = vector.broadcast %910 : vector<1x2xi32> to vector<8x2xi32>
    %912 = arith.select %909, %911, %907 : vector<8x2xi1>, vector<8x2xi32>
    %c0_374 = arith.constant 0 : index
    %c0_375 = arith.constant 0 : index
    %c0_376 = arith.constant 0 : index
    %913 = vector.load %arg3[%c0_374, %c0_375, %c0_376] : memref<1x8x2xi32, #tpu.memory_space<vmem>>, vector<1x8x2xi32>
    %914 = vector.shape_cast %913 : vector<1x8x2xi32> to vector<8x2xi32>
    %915 = vector.shape_cast %912 : vector<8x2xi32> to vector<1x8x2xi32>
    tpu.vector_store %arg3[%c0_374, %c0_375, %c0_376], %915 {strides = array<i32>} : memref<1x8x2xi32, #tpu.memory_space<vmem>>, vector<1x8x2xi32>,
    return
  }
  func.func @transform_0(%arg0: i32) -> (i32, i32, i32) {
    %c0_i32 = arith.constant 0 : i32
    %c0_i32_0 = arith.constant 0 : i32
    %c0_i32_1 = arith.constant 0 : i32
    return %c0_i32, %c0_i32_0, %arg0 : i32, i32, i32
  }
  func.func @transform_1(%arg0: i32) -> (i32, i32) {
    %c0_i32 = arith.constant 0 : i32
    %c0_i32_0 = arith.constant 0 : i32
    %c0_i32_1 = arith.constant 0 : i32
    return %c0_i32, %c0_i32_0 : i32, i32
  }
  func.func @transform_2(%arg0: i32) -> (i32, i32, i32) {
    %c0_i32 = arith.constant 0 : i32
    %c0_i32_0 = arith.constant 0 : i32
    %c0_i32_1 = arith.constant 0 : i32
    return %c0_i32, %c0_i32_0, %arg0 : i32, i32, i32
  }
}

</mosaic_0001>

<bundles_post_ra>
// kernel: tpu_custom_call.1
= control target key start
LH: loop header
LB: loop body
LE: loop exit
PB: predicated region body
PF: predicated region fallthrough
CT: control target
= control target key end

     0   :  { %v851_v0 = vmov 2   ;;  %v852_v1 = vmov 0   ;;  %v853_v3 = vmov 3   ;;  %v854_v4 = vmov 1   ;;  %s1156_s1 = inlined_call_operand.vmem [shape: f32[8,8], index: 1, kind: input, shape index: {}]   ;;  %s1157_s0 = inlined_call_operand.vmem [shape: f32[8,8,2], index: 0, kind: input, shape index: {}]   ;;  %s1158_s2 = inlined_call_operand.vmem [shape: s32[1,8,2], index: 2, kind: output, shape index: {}]  }
   0x1   :  { %844 = vset.pattern.permute.xlu1 %v851_v0  ;;  %842 = vset.pattern.permute.xlu0 %v852_v1  ;;  %v11_v2 = vld [vmem:[%s1156_s1] sm:$0xff]  ;;  %v855_v5 = vmov 4   ;;  %v856_v6 = vmov 5   ;;  %v857_v7 = vmov 6   ;;  %v858_v8 = vmov 7   ;;  %v827_v63 = vld [vmem:[%s1157_s0 + $0x8] sm:$0xff] }
   0x2   :  { %26 = vperm.xlu1 %844, %v11_v2   ;;  %14 = vperm.xlu0 %842, %v11_v2   ;;  %vm17_vm0 = vcmask 15360   ;;  %v63_v13 = vlaneseq  ;;  %v61_v24 = vld [vmem:[%s1157_s0] sm:$0xff] }
   0x4   :  { %v887_v16 = vshrl.u32 %v63_v13, 7 }
   0x6   :  { %845 = vset.pattern.permute.xlu1 %v853_v3  ;;  %843 = vset.pattern.permute.xlu0 %v854_v4  ;;  %v890_v18 = vsub.s32 0, %v887_v16  ;;  %v893_v19 = vsub.s32 3, %v887_v16  ;;  %v896_v20 = vsub.s32 1, %v887_v16  ;;  %v900_v21 = vsub.s32 2, %v887_v16 }
   0x7   :  { %32 = vperm.xlu1 %845, %v11_v2   ;;  %20 = vperm.xlu0 %843, %v11_v2   ;;  %v903_v22 = vsub.s32 4, %v887_v16  ;;  %v906_v23 = vsub.s32 5, %v887_v16  ;;  %v921_v32 = vsub.s32 6, %v887_v16  ;;  %v924_v33 = vsub.s32 7, %v887_v16 }
   0x8   :  { %v66_v25 = vrot.slane %v61_v24, %v890_v18  ;;  %v84_v26 = vrot.slane %v61_v24, %v893_v19  ;;  %v72_v27 = vrot.slane %v61_v24, %v896_v20  ;;  %v78_v34 = vrot.slane %v61_v24, %v900_v21 }
   0x9   :  { %v90_v35 = vrot.slane %v61_v24, %v903_v22  ;;  %v96_v36 = vrot.slane %v61_v24, %v906_v23  ;;  %v102_v43 = vrot.slane %v61_v24, %v921_v32  ;;  %v108_v44 = vrot.slane %v61_v24, %v924_v33 }
   0xb   :  { %846 = vset.pattern.permute.xlu1 %v855_v5  ;;  %847 = vset.pattern.permute.xlu0 %v856_v6 }
   0xc   :  { %38 = vperm.xlu1 %846, %v11_v2   ;;  %44 = vperm.xlu0 %847, %v11_v2  }
  0x10   :  { %848 = vset.pattern.permute.xlu1 %v857_v7  ;;  %850 = vset.pattern.permute.xlu0 %v858_v8 }
  0x11   :  { %50 = vperm.xlu1 %848, %v11_v2  }
  0x15   :  { %849 = vset.pattern.permute.xlu1 %v858_v8 }
  0x16   :  { %56 = vperm.xlu1 %849, %v11_v2  }
  0x7d   :  { %v27_v9 = vpop.permute.xlu1 %26  ;;  %v15_v10 = vpop.permute.xlu0 %14 }
  0x7e   :  { %30 = vst.msk [vmem:[#allocation3 + $0x10] sm:$0xff] %vm17_vm0, %v27_v9  ;;  %18 = vst.msk [vmem:[#allocation3] sm:$0xff] %vm17_vm0, %v15_v10 }
  0x82   :  { %v33_v11 = vpop.permute.xlu1 %32  ;;  %v21_v12 = vpop.permute.xlu0 %20 }
  0x83   :  { %36 = vst.msk [vmem:[#allocation3 + $0x18] sm:$0xff] %vm17_vm0, %v33_v11  ;;  %24 = vst.msk [vmem:[#allocation3 + $0x8] sm:$0xff] %vm17_vm0, %v21_v12 }
  0x85   :  { %v914_v29 = vld [vmem:[#allocation3] sm:$0xff]  ;;  %v930_v37 = vld [vmem:[#allocation3 + $0x10] sm:$0xff] }
  0x86   :  { %v67_v40 = vadd.f32 %v66_v25, %v914_v29  ;;  %v79_v45 = vadd.f32 %v78_v34, %v930_v37 }
  0x87   :  { %v39_v14 = vpop.permute.xlu1 %38  ;;  %v45_v15 = vpop.permute.xlu0 %44 }
  0x88   :  { %42 = vst.msk [vmem:[#allocation3 + $0x20] sm:$0xff] %vm17_vm0, %v39_v14  ;;  %48 = vst.msk [vmem:[#allocation3 + $0x28] sm:$0xff] %vm17_vm0, %v45_v15 }
  0x8a   :  { %v916_v30 = vld [vmem:[#allocation3 + $0x18] sm:$0xff]  ;;  %v918_v31 = vld [vmem:[#allocation3 + $0x8] sm:$0xff] }
  0x8b   :  { %v85_v41 = vadd.f32 %v84_v26, %v916_v30  ;;  %v73_v42 = vadd.f32 %v72_v27, %v918_v31 }
  0x8c   :  { %v51_v17 = vpop.permute.xlu1 %50 }
  0x8d   :  { %54 = vst.msk [vmem:[#allocation3 + $0x30] sm:$0xff] %vm17_vm0, %v51_v17  ;;  %v114_v49 = vmax.f32 %v79_v45, %v85_v41  ;;  %v111_v50 = vmax.f32 %v67_v40, %v73_v42  ;;  %vm113_vm1 = vcmp.gt.f32.partialorder %v85_v41, %v79_v45  ;;  %vm110_vm2 = vcmp.gt.f32.partialorder %v73_v42, %v67_v40 }
  0x8e   :  { %v115_v56 = vsel %vm113_vm1, 3, %v851_v0  ;;  %v112_v57 = vsel %vm110_vm2, 1, %v852_v1 }
  0x8f   :  { %v932_v38 = vld [vmem:[#allocation3 + $0x20] sm:$0xff]  ;;  %v934_v39 = vld [vmem:[#allocation3 + $0x28] sm:$0xff]  ;;  %vm122_vm5 = vcmp.gt.f32.partialorder %v114_v49, %v111_v50  ;;  %v123_v59 = vmax.f32 %v111_v50, %v114_v49 }
  0x90   :  { %v91_v46 = vadd.f32 %v90_v35, %v932_v38  ;;  %v97_v47 = vadd.f32 %v96_v36, %v934_v39  ;;  %v124_v2 = vsel %vm122_vm5, %v115_v56, %v112_v57 }
  0x91   :  { %v57_v28 = vpop.permute.xlu1 %56 }
  0x92   :  { %60 = vst.msk [vmem:[#allocation3 + $0x38] sm:$0xff] %vm17_vm0, %v57_v28  ;;  %vm116_vm3 = vcmp.gt.f32.partialorder %v97_v47, %v91_v46  ;;  %v117_v54 = vmax.f32 %v91_v46, %v97_v47 }
  0x93   :  { %v118_v60 = vsel %vm116_vm3, 5, %v855_v5 }
  0x94   :  { %v944_v48 = vld [vmem:[#allocation3 + $0x30] sm:$0xff] }
  0x95   :  { %v103_v52 = vadd.f32 %v102_v43, %v944_v48 }
  0x99   :  { %v946_v51 = vld [vmem:[#allocation3 + $0x38] sm:$0xff] }
  0x9a   :  { %v109_v53 = vadd.f32 %v108_v44, %v946_v51 }
  0x9c   :  { %vm119_vm4 = vcmp.gt.f32.partialorder %v109_v53, %v103_v52  ;;  %v120_v55 = vmax.f32 %v103_v52, %v109_v53  ;;  %v828_v53 = vld [vmem:[%s1157_s0 + $0x10] sm:$0xff] }
  0x9d   :  { %v121_v58 = vsel %vm119_vm4, 7, %v857_v7 }
  0x9e   :  { %vm125_vm6 = vcmp.gt.f32.partialorder %v120_v55, %v117_v54  ;;  %v126_v61 = vmax.f32 %v117_v54, %v120_v55 }
  0x9f   :  { %v127_v62 = vsel %vm125_vm6, %v121_v58, %v118_v60 }
  0xa0   :  { %vm128_vm7 = vcmp.gt.f32.partialorder %v126_v61, %v123_v59  ;;  %v129_v3 = vmax.f32 %v123_v59, %v126_v61 }
  0xa1   :  { %v130_v4 = vsel %vm128_vm7, %v127_v62, %v124_v2 }
  0xa2   :  { %132 = vst.msk [vmem:[#allocation2 + $0x8] sm:$0xff] %vm17_vm0, %v130_v4  ;;  %v135_v6 = vadd.f32 %v827_v63, %v129_v3 }
  0xa4   :  { %v140_v8 = vrot.slane %v135_v6, %v890_v18  ;;  %v146_v9 = vrot.slane %v135_v6, %v896_v20  ;;  %v152_v10 = vrot.slane %v135_v6, %v900_v21  ;;  %v158_v11 = vrot.slane %v135_v6, %v893_v19 }
  0xa5   :  { %v164_v12 = vrot.slane %v135_v6, %v903_v22  ;;  %v170_v13 = vrot.slane %v135_v6, %v906_v23  ;;  %v176_v14 = vrot.slane %v135_v6, %v921_v32  ;;  %v182_v15 = vrot.slane %v135_v6, %v924_v33 }
  0xa6   :  { %v141_v17 = vadd.f32 %v140_v8, %v914_v29  ;;  %v147_v24 = vadd.f32 %v146_v9, %v918_v31  ;;  %v153_v25 = vadd.f32 %v152_v10, %v930_v37  ;;  %v159_v26 = vadd.f32 %v158_v11, %v916_v30 }
  0xa7   :  { %v165_v27 = vadd.f32 %v164_v12, %v932_v38  ;;  %v171_v28 = vadd.f32 %v170_v13, %v934_v39  ;;  %v177_v34 = vadd.f32 %v176_v14, %v944_v48  ;;  %v183_v35 = vadd.f32 %v182_v15, %v946_v51 }
  0xa8   :  { %vm184_vm8 = vcmp.gt.f32.partialorder %v147_v24, %v141_v17  ;;  %v185_v36 = vmax.f32 %v141_v17, %v147_v24  ;;  %vm187_vm9 = vcmp.gt.f32.partialorder %v159_v26, %v153_v25  ;;  %v188_v40 = vmax.f32 %v153_v25, %v159_v26 }
  0xa9   :  { %v186_v41 = vsel %vm184_vm8, 1, %v852_v1  ;;  %v189_v42 = vsel %vm187_vm9, 3, %v851_v0  ;;  %vm190_vm10 = vcmp.gt.f32.partialorder %v171_v28, %v165_v27  ;;  %v191_v43 = vmax.f32 %v165_v27, %v171_v28 }
  0xaa   :  { %v192_v44 = vsel %vm190_vm10, 5, %v855_v5  ;;  %vm193_vm11 = vcmp.gt.f32.partialorder %v183_v35, %v177_v34  ;;  %v194_v45 = vmax.f32 %v177_v34, %v183_v35  ;;  %vm196_vm12 = vcmp.gt.f32.partialorder %v188_v40, %v185_v36 }
  0xab   :  { %v195_v46 = vsel %vm193_vm11, 7, %v857_v7  ;;  %v197_v47 = vmax.f32 %v185_v36, %v188_v40  ;;  %v198_v49 = vsel %vm196_vm12, %v189_v42, %v186_v41  ;;  %v829_v40 = vld [vmem:[%s1157_s0 + $0x18] sm:$0xff] }
  0xac   :  { %vm199_vm13 = vcmp.gt.f32.partialorder %v194_v45, %v191_v43  ;;  %v200_v50 = vmax.f32 %v191_v43, %v194_v45 }
  0xad   :  { %v201_v52 = vsel %vm199_vm13, %v195_v46, %v192_v44 }
  0xae   :  { %vm202_vm14 = vcmp.gt.f32.partialorder %v200_v50, %v197_v47  ;;  %v203_v54 = vmax.f32 %v197_v47, %v200_v50 }
  0xaf   :  { %v204_v55 = vsel %vm202_vm14, %v201_v52, %v198_v49 }
  0xb0   :  { %206 = vst.msk [vmem:[#allocation2 + $0x10] sm:$0xff] %vm17_vm0, %v204_v55  ;;  %v209_v56 = vadd.f32 %v828_v53, %v203_v54 }
  0xb2   :  { %v214_v57 = vrot.slane %v209_v56, %v890_v18  ;;  %v220_v58 = vrot.slane %v209_v56, %v896_v20  ;;  %v226_v59 = vrot.slane %v209_v56, %v900_v21  ;;  %v232_v60 = vrot.slane %v209_v56, %v893_v19 }
  0xb3   :  { %v238_v61 = vrot.slane %v209_v56, %v903_v22  ;;  %v244_v62 = vrot.slane %v209_v56, %v906_v23  ;;  %v250_v63 = vrot.slane %v209_v56, %v921_v32  ;;  %v256_v2 = vrot.slane %v209_v56, %v924_v33 }
  0xb4   :  { %v215_v3 = vadd.f32 %v214_v57, %v914_v29  ;;  %v221_v4 = vadd.f32 %v220_v58, %v918_v31  ;;  %v227_v6 = vadd.f32 %v226_v59, %v930_v37  ;;  %v233_v8 = vadd.f32 %v232_v60, %v916_v30 }
  0xb5   :  { %v239_v9 = vadd.f32 %v238_v61, %v932_v38  ;;  %v245_v10 = vadd.f32 %v244_v62, %v934_v39  ;;  %v251_v11 = vadd.f32 %v250_v63, %v944_v48  ;;  %v257_v12 = vadd.f32 %v256_v2, %v946_v51 }
  0xb6   :  { %vm258_vm15 = vcmp.gt.f32.partialorder %v221_v4, %v215_v3  ;;  %v259_v13 = vmax.f32 %v215_v3, %v221_v4  ;;  %vm261_vm1 = vcmp.gt.f32.partialorder %v233_v8, %v227_v6  ;;  %v262_v14 = vmax.f32 %v227_v6, %v233_v8 }
  0xb7   :  { %v260_v15 = vsel %vm258_vm15, 1, %v852_v1  ;;  %v263_v17 = vsel %vm261_vm1, 3, %v851_v0  ;;  %vm264_vm2 = vcmp.gt.f32.partialorder %v245_v10, %v239_v9  ;;  %v265_v24 = vmax.f32 %v239_v9, %v245_v10 }
  0xb8   :  { %v266_v25 = vsel %vm264_vm2, 5, %v855_v5  ;;  %vm267_vm3 = vcmp.gt.f32.partialorder %v257_v12, %v251_v11  ;;  %v268_v26 = vmax.f32 %v251_v11, %v257_v12  ;;  %vm270_vm4 = vcmp.gt.f32.partialorder %v262_v14, %v259_v13 }
  0xb9   :  { %v269_v27 = vsel %vm267_vm3, 7, %v857_v7  ;;  %v271_v28 = vmax.f32 %v259_v13, %v262_v14  ;;  %v272_v34 = vsel %vm270_vm4, %v263_v17, %v260_v15  ;;  %v830_v14 = vld [vmem:[%s1157_s0 + $0x20] sm:$0xff] }
  0xba   :  { %vm273_vm5 = vcmp.gt.f32.partialorder %v268_v26, %v265_v24  ;;  %v274_v35 = vmax.f32 %v265_v24, %v268_v26 }
  0xbb   :  { %v275_v36 = vsel %vm273_vm5, %v269_v27, %v266_v25 }
  0xbc   :  { %vm276_vm6 = vcmp.gt.f32.partialorder %v274_v35, %v271_v28  ;;  %v277_v41 = vmax.f32 %v271_v28, %v274_v35 }
  0xbd   :  { %v278_v42 = vsel %vm276_vm6, %v275_v36, %v272_v34 }
  0xbe   :  { %280 = vst.msk [vmem:[#allocation2 + $0x18] sm:$0xff] %vm17_vm0, %v278_v42  ;;  %v283_v43 = vadd.f32 %v829_v40, %v277_v41 }
  0xc0   :  { %v288_v44 = vrot.slane %v283_v43, %v890_v18  ;;  %v294_v45 = vrot.slane %v283_v43, %v896_v20  ;;  %v300_v46 = vrot.slane %v283_v43, %v900_v21  ;;  %v306_v47 = vrot.slane %v283_v43, %v893_v19 }
  0xc1   :  { %v312_v49 = vrot.slane %v283_v43, %v903_v22  ;;  %v318_v50 = vrot.slane %v283_v43, %v906_v23  ;;  %v324_v52 = vrot.slane %v283_v43, %v921_v32  ;;  %v330_v53 = vrot.slane %v283_v43, %v924_v33 }
  0xc2   :  { %v289_v54 = vadd.f32 %v288_v44, %v914_v29  ;;  %v295_v55 = vadd.f32 %v294_v45, %v918_v31  ;;  %v301_v56 = vadd.f32 %v300_v46, %v930_v37  ;;  %v307_v57 = vadd.f32 %v306_v47, %v916_v30 }
  0xc3   :  { %v313_v58 = vadd.f32 %v312_v49, %v932_v38  ;;  %v319_v59 = vadd.f32 %v318_v50, %v934_v39  ;;  %v325_v60 = vadd.f32 %v324_v52, %v944_v48  ;;  %v331_v61 = vadd.f32 %v330_v53, %v946_v51 }
  0xc4   :  { %vm332_vm7 = vcmp.gt.f32.partialorder %v295_v55, %v289_v54  ;;  %v333_v62 = vmax.f32 %v289_v54, %v295_v55  ;;  %vm335_vm8 = vcmp.gt.f32.partialorder %v307_v57, %v301_v56  ;;  %v336_v63 = vmax.f32 %v301_v56, %v307_v57 }
  0xc5   :  { %v334_v2 = vsel %vm332_vm7, 1, %v852_v1  ;;  %v337_v3 = vsel %vm335_vm8, 3, %v851_v0  ;;  %vm338_vm9 = vcmp.gt.f32.partialorder %v319_v59, %v313_v58  ;;  %v339_v4 = vmax.f32 %v313_v58, %v319_v59 }
  0xc6   :  { %v340_v6 = vsel %vm338_vm9, 5, %v855_v5  ;;  %vm341_vm10 = vcmp.gt.f32.partialorder %v331_v61, %v325_v60  ;;  %v342_v8 = vmax.f32 %v325_v60, %v331_v61  ;;  %vm344_vm11 = vcmp.gt.f32.partialorder %v336_v63, %v333_v62 }
  0xc7   :  { %v343_v9 = vsel %vm341_vm10, 7, %v857_v7  ;;  %v345_v10 = vmax.f32 %v333_v62, %v336_v63  ;;  %v346_v11 = vsel %vm344_vm11, %v337_v3, %v334_v2  ;;  %v831_v63 = vld [vmem:[%s1157_s0 + $0x28] sm:$0xff] }
  0xc8   :  { %vm347_vm12 = vcmp.gt.f32.partialorder %v342_v8, %v339_v4  ;;  %v348_v12 = vmax.f32 %v339_v4, %v342_v8 }
  0xc9   :  { %v349_v13 = vsel %vm347_vm12, %v343_v9, %v340_v6 }
  0xca   :  { %vm350_vm13 = vcmp.gt.f32.partialorder %v348_v12, %v345_v10  ;;  %v351_v15 = vmax.f32 %v345_v10, %v348_v12 }
  0xcb   :  { %v352_v17 = vsel %vm350_vm13, %v349_v13, %v346_v11 }
  0xcc   :  { %354 = vst.msk [vmem:[#allocation2 + $0x20] sm:$0xff] %vm17_vm0, %v352_v17  ;;  %v357_v24 = vadd.f32 %v830_v14, %v351_v15 }
  0xce   :  { %v362_v25 = vrot.slane %v357_v24, %v890_v18  ;;  %v368_v26 = vrot.slane %v357_v24, %v896_v20  ;;  %v374_v27 = vrot.slane %v357_v24, %v900_v21  ;;  %v380_v28 = vrot.slane %v357_v24, %v893_v19 }
  0xcf   :  { %v386_v34 = vrot.slane %v357_v24, %v903_v22  ;;  %v392_v35 = vrot.slane %v357_v24, %v906_v23  ;;  %v398_v36 = vrot.slane %v357_v24, %v921_v32  ;;  %v404_v40 = vrot.slane %v357_v24, %v924_v33 }
  0xd0   :  { %v363_v41 = vadd.f32 %v362_v25, %v914_v29  ;;  %v369_v42 = vadd.f32 %v368_v26, %v918_v31  ;;  %v375_v43 = vadd.f32 %v374_v27, %v930_v37  ;;  %v381_v44 = vadd.f32 %v380_v28, %v916_v30 }
  0xd1   :  { %v387_v45 = vadd.f32 %v386_v34, %v932_v38  ;;  %v393_v46 = vadd.f32 %v392_v35, %v934_v39  ;;  %v399_v47 = vadd.f32 %v398_v36, %v944_v48  ;;  %v405_v49 = vadd.f32 %v404_v40, %v946_v51 }
  0xd2   :  { %vm406_vm14 = vcmp.gt.f32.partialorder %v369_v42, %v363_v41  ;;  %v407_v50 = vmax.f32 %v363_v41, %v369_v42  ;;  %vm409_vm15 = vcmp.gt.f32.partialorder %v381_v44, %v375_v43  ;;  %v410_v52 = vmax.f32 %v375_v43, %v381_v44 }
  0xd3   :  { %v408_v53 = vsel %vm406_vm14, 1, %v852_v1  ;;  %v411_v54 = vsel %vm409_vm15, 3, %v851_v0  ;;  %vm412_vm1 = vcmp.gt.f32.partialorder %v393_v46, %v387_v45  ;;  %v413_v55 = vmax.f32 %v387_v45, %v393_v46 }
  0xd4   :  { %v414_v56 = vsel %vm412_vm1, 5, %v855_v5  ;;  %vm415_vm2 = vcmp.gt.f32.partialorder %v405_v49, %v399_v47  ;;  %v416_v57 = vmax.f32 %v399_v47, %v405_v49  ;;  %vm418_vm3 = vcmp.gt.f32.partialorder %v410_v52, %v407_v50 }
  0xd5   :  { %v417_v58 = vsel %vm415_vm2, 7, %v857_v7  ;;  %v419_v59 = vmax.f32 %v407_v50, %v410_v52  ;;  %v420_v60 = vsel %vm418_vm3, %v411_v54, %v408_v53  ;;  %v832_v52 = vld [vmem:[%s1157_s0 + $0x30] sm:$0xff] }
  0xd6   :  { %vm421_vm4 = vcmp.gt.f32.partialorder %v416_v57, %v413_v55  ;;  %v422_v61 = vmax.f32 %v413_v55, %v416_v57 }
  0xd7   :  { %v423_v62 = vsel %vm421_vm4, %v417_v58, %v414_v56 }
  0xd8   :  { %vm424_vm5 = vcmp.gt.f32.partialorder %v422_v61, %v419_v59  ;;  %v425_v2 = vmax.f32 %v419_v59, %v422_v61 }
  0xd9   :  { %v426_v3 = vsel %vm424_vm5, %v423_v62, %v420_v60 }
  0xda   :  { %428 = vst.msk [vmem:[#allocation2 + $0x28] sm:$0xff] %vm17_vm0, %v426_v3  ;;  %v431_v4 = vadd.f32 %v831_v63, %v425_v2 }
  0xdc   :  { %v436_v6 = vrot.slane %v431_v4, %v890_v18  ;;  %v442_v8 = vrot.slane %v431_v4, %v896_v20  ;;  %v448_v9 = vrot.slane %v431_v4, %v900_v21  ;;  %v454_v10 = vrot.slane %v431_v4, %v893_v19 }
  0xdd   :  { %v460_v11 = vrot.slane %v431_v4, %v903_v22  ;;  %v466_v12 = vrot.slane %v431_v4, %v906_v23  ;;  %v472_v13 = vrot.slane %v431_v4, %v921_v32  ;;  %v478_v14 = vrot.slane %v431_v4, %v924_v33 }
  0xde   :  { %v437_v15 = vadd.f32 %v436_v6, %v914_v29  ;;  %v443_v17 = vadd.f32 %v442_v8, %v918_v31  ;;  %v449_v24 = vadd.f32 %v448_v9, %v930_v37  ;;  %v455_v25 = vadd.f32 %v454_v10, %v916_v30  ;;  %v833_v9 = vld [vmem:[%s1157_s0 + $0x38] sm:$0xff] }
  0xdf   :  { %v461_v26 = vadd.f32 %v460_v11, %v932_v38  ;;  %v467_v27 = vadd.f32 %v466_v12, %v934_v39  ;;  %v473_v28 = vadd.f32 %v472_v13, %v944_v48  ;;  %v479_v34 = vadd.f32 %v478_v14, %v946_v51 }
  0xe0   :  { %vm480_vm6 = vcmp.gt.f32.partialorder %v443_v17, %v437_v15  ;;  %v481_v35 = vmax.f32 %v437_v15, %v443_v17  ;;  %vm483_vm7 = vcmp.gt.f32.partialorder %v455_v25, %v449_v24  ;;  %v484_v36 = vmax.f32 %v449_v24, %v455_v25 }
  0xe1   :  { %v482_v40 = vsel %vm480_vm6, 1, %v852_v1  ;;  %v485_v41 = vsel %vm483_vm7, 3, %v851_v0  ;;  %vm486_vm8 = vcmp.gt.f32.partialorder %v467_v27, %v461_v26  ;;  %v487_v42 = vmax.f32 %v461_v26, %v467_v27 }
  0xe2   :  { %v488_v43 = vsel %vm486_vm8, 5, %v855_v5  ;;  %vm489_vm9 = vcmp.gt.f32.partialorder %v479_v34, %v473_v28  ;;  %v490_v44 = vmax.f32 %v473_v28, %v479_v34  ;;  %vm492_vm10 = vcmp.gt.f32.partialorder %v484_v36, %v481_v35 }
  0xe3   :  { %v491_v45 = vsel %vm489_vm9, 7, %v857_v7  ;;  %v493_v46 = vmax.f32 %v481_v35, %v484_v36  ;;  %v494_v47 = vsel %vm492_vm10, %v485_v41, %v482_v40 }
  0xe4   :  { %vm495_vm11 = vcmp.gt.f32.partialorder %v490_v44, %v487_v42  ;;  %v496_v49 = vmax.f32 %v487_v42, %v490_v44 }
  0xe5   :  { %v497_v50 = vsel %vm495_vm11, %v491_v45, %v488_v43 }
  0xe6   :  { %vm498_vm12 = vcmp.gt.f32.partialorder %v496_v49, %v493_v46  ;;  %v499_v53 = vmax.f32 %v493_v46, %v496_v49 }
  0xe7   :  { %v500_v54 = vsel %vm498_vm12, %v497_v50, %v494_v47 }
  0xe8   :  { %502 = vst.msk [vmem:[#allocation2 + $0x30] sm:$0xff] %vm17_vm0, %v500_v54  ;;  %v505_v55 = vadd.f32 %v832_v52, %v499_v53 }
  0xea   :  { %v510_v56 = vrot.slane %v505_v55, %v890_v18  ;;  %v516_v57 = vrot.slane %v505_v55, %v896_v20  ;;  %v522_v58 = vrot.slane %v505_v55, %v900_v21  ;;  %v528_v59 = vrot.slane %v505_v55, %v893_v19 }
  0xeb   :  { %v534_v60 = vrot.slane %v505_v55, %v903_v22  ;;  %v540_v61 = vrot.slane %v505_v55, %v906_v23  ;;  %v546_v62 = vrot.slane %v505_v55, %v921_v32  ;;  %v552_v63 = vrot.slane %v505_v55, %v924_v33 }
  0xec   :  { %v511_v2 = vadd.f32 %v510_v56, %v914_v29  ;;  %v517_v3 = vadd.f32 %v516_v57, %v918_v31  ;;  %v523_v18 = vadd.f32 %v522_v58, %v930_v37  ;;  %v529_v20 = vadd.f32 %v528_v59, %v916_v30 }
  0xed   :  { %v535_v21 = vadd.f32 %v534_v60, %v932_v38  ;;  %v541_v19 = vadd.f32 %v540_v61, %v934_v39  ;;  %v547_v4 = vadd.f32 %v546_v62, %v944_v48  ;;  %v553_v23 = vadd.f32 %v552_v63, %v946_v51 }
  0xee   :  { %vm554_vm13 = vcmp.gt.f32.partialorder %v517_v3, %v511_v2  ;;  %v555_v32 = vmax.f32 %v511_v2, %v517_v3  ;;  %vm557_vm14 = vcmp.gt.f32.partialorder %v529_v20, %v523_v18  ;;  %v558_v33 = vmax.f32 %v523_v18, %v529_v20 }
  0xef   :  { %v556_v29 = vsel %vm554_vm13, 1, %v852_v1  ;;  %v559_v31 = vsel %vm557_vm14, 3, %v851_v0  ;;  %vm560_vm15 = vcmp.gt.f32.partialorder %v541_v19, %v535_v21  ;;  %v561_v37 = vmax.f32 %v535_v21, %v541_v19  ;;  %v636_v63 = vld [vmem:[#allocation2 + $0x30] sm:$0xff] }
  0xf0   :  { %v562_v30 = vsel %vm560_vm15, 5, %v855_v5  ;;  %vm563_vm1 = vcmp.gt.f32.partialorder %v553_v23, %v547_v4  ;;  %v564_v38 = vmax.f32 %v547_v4, %v553_v23  ;;  %vm566_vm2 = vcmp.gt.f32.partialorder %v558_v33, %v555_v32 }
  0xf1   :  { %v565_v39 = vsel %vm563_vm1, 7, %v857_v7  ;;  %v567_v48 = vmax.f32 %v555_v32, %v558_v33  ;;  %v568_v6 = vsel %vm566_vm2, %v559_v31, %v556_v29  ;;  %v639_v20 = vrot.slane %v636_v63, 5 }
  0xf2   :  { %vm569_vm3 = vcmp.gt.f32.partialorder %v564_v38, %v561_v37  ;;  %v570_v51 = vmax.f32 %v561_v37, %v564_v38  ;;  %v640_v21 = vrot.slane %v636_v63, 4  ;;  %v642_v4 = vrot.slane %v636_v63, 7 }
  0xf3   :  { %v571_v8 = vsel %vm569_vm3, %v565_v39, %v562_v30  ;;  %v643_v33 = vrot.slane %v636_v63, 6  ;;  %v645_v29 = vrot.slane %v636_v63, 1  ;;  %v647_v31 = vrot.slane %v636_v63, 3 }
  0xf4   :  { %vm572_vm4 = vcmp.gt.f32.partialorder %v570_v51, %v567_v48  ;;  %v573_v10 = vmax.f32 %v567_v48, %v570_v51  ;;  %v648_v37 = vrot.slane %v636_v63, 2 }
  0xf5   :  { %v574_v11 = vsel %vm572_vm4, %v571_v8, %v568_v6  ;;  %v659_v8 = vld [vmem:[#allocation2 + $0x28] sm:$0xff] }
  0xf6   :  { %576 = vst.msk [vmem:[#allocation2 + $0x38] sm:$0xff] %vm17_vm0, %v574_v11  ;;  %v579_v12 = vadd.f32 %v833_v9, %v573_v10 }
  0xf8   :  { %v581_v13 = vrot.slane %v579_v12, 7  ;;  %v584_v14 = vrot.slane %v579_v12, 1 }
  0xfa   :  { %vm583_vm5 = vcmp.gt.f32.partialorder %v579_v12, %v581_v13  ;;  %v586_v15 = vmax.f32 %v579_v12, %v584_v14  ;;  %v662_v12 = vrot.slane %v659_v8, 5  ;;  %v663_v13 = vrot.slane %v659_v8, 4 }
  0xfb   :  { %v587_v17 = vsel %vm583_vm5, 1, %v852_v1  ;;  %v588_v24 = vsel %vm583_vm5, 3, %v851_v0  ;;  %v589_v25 = vsel %vm583_vm5, 5, %v855_v5  ;;  %v590_v26 = vsel %vm583_vm5, 7, %v857_v7 }
  0xfc   :  { %v592_v27 = vrot.slane %v586_v15, 6  ;;  %v595_v28 = vrot.slane %v586_v15, 2  ;;  %v598_v34 = vrot.slane %v588_v24, 1  ;;  %v599_v35 = vrot.slane %v587_v17, 7 }
  0xfd   :  { %v601_v36 = vrot.slane %v590_v26, 1  ;;  %v602_v40 = vrot.slane %v589_v25, 7  ;;  %v613_v1 = vld [vmem:[#allocation2 + $0x38] sm:$0xff]  ;;  %v666_v25 = vrot.slane %v659_v8, 6  ;;  %v668_v26 = vrot.slane %v659_v8, 1 }
  0xfe   :  { %vm594_vm6 = vcmp.gt.f32.partialorder %v586_v15, %v592_v27  ;;  %v597_v41 = vmax.f32 %v586_v15, %v595_v28  ;;  %v616_v5 = vrot.slane %v613_v1, 5  ;;  %v617_v47 = vrot.slane %v613_v1, 4 }
  0xff   :  { %v600_v42 = vsel %vm594_vm6, %v598_v34, %v599_v35  ;;  %v603_v43 = vsel %vm594_vm6, %v601_v36, %v602_v40  ;;  %v619_v49 = vrot.slane %v613_v1, 7  ;;  %v620_v53 = vrot.slane %v613_v1, 6 }
 0x100   :  { %v605_v44 = vrot.slane %v597_v41, 4  ;;  %v608_v45 = vrot.slane %v603_v43, 2  ;;  %v609_v46 = vrot.slane %v600_v42, 6  ;;  %v622_v54 = vrot.slane %v613_v1, 1  ;;  %v682_v43 = vld [vmem:[#allocation2 + $0x20] sm:$0xff] }
 0x101   :  { %v624_v55 = vrot.slane %v613_v1, 3  ;;  %v625_v56 = vrot.slane %v613_v1, 2  ;;  %v665_v15 = vrot.slane %v659_v8, 7  ;;  %v670_v27 = vrot.slane %v659_v8, 3 }
 0x102   :  { %vm607_vm7 = vcmp.gt.f32.partialorder %v597_v41, %v605_v44  ;;  %v671_v28 = vrot.slane %v659_v8, 2 }
 0x103   :  { %v1106_v0 = vsel %vm607_vm7, %v608_v45, %v609_v46 }
 0x104   :  { %v614_v7 = vand.u32 1, %v1106_v0  ;;  %v627_v50 = vshra.s32 %v1106_v0, 1  ;;  %v632_v52 = vshra.s32 %v1106_v0, 2 }
 0x106   :  { %vm615_vm8 = vcmp.eq.s32.totalorder %v614_v7, 1  ;;  %v628_v57 = vand.u32 1, %v627_v50  ;;  %v633_v58 = vand.u32 1, %v632_v52  ;;  %v688_v7 = vrot.slane %v682_v43, 7 }
 0x107   :  { %v618_v59 = vsel %vm615_vm8, %v616_v5, %v617_v47  ;;  %v621_v60 = vsel %vm615_vm8, %v619_v49, %v620_v53  ;;  %v623_v61 = vsel %vm615_vm8, %v622_v54, %v613_v1  ;;  %v626_v62 = vsel %vm615_vm8, %v624_v55, %v625_v56 }
 0x108   :  { %vm629_vm9 = vcmp.eq.s32.totalorder %v628_v57, 1  ;;  %vm634_vm10 = vcmp.eq.s32.totalorder %v633_v58, 1  ;;  %v685_v1 = vrot.slane %v682_v43, 5  ;;  %v686_v5 = vrot.slane %v682_v43, 4 }
 0x109   :  { %v630_v2 = vsel %vm629_vm9, %v621_v60, %v618_v59  ;;  %v631_v3 = vsel %vm629_vm9, %v626_v62, %v623_v61  ;;  %v689_v52 = vrot.slane %v682_v43, 6  ;;  %v691_v53 = vrot.slane %v682_v43, 1  ;;  %v705_v62 = vld [vmem:[#allocation2 + $0x18] sm:$0xff] }
 0x10a   :  { %v1111_v18 = vsel %vm634_vm10, %v631_v3, %v630_v2  ;;  %v693_v54 = vrot.slane %v682_v43, 3  ;;  %v694_v55 = vrot.slane %v682_v43, 2 }
 0x10b   :  { %v637_v19 = vand.u32 1, %v1111_v18  ;;  %v650_v23 = vshra.s32 %v1111_v18, 1  ;;  %v655_v32 = vshra.s32 %v1111_v18, 2 }
 0x10d   :  { %vm638_vm11 = vcmp.eq.s32.totalorder %v637_v19, 1  ;;  %v651_v30 = vand.u32 1, %v650_v23  ;;  %v656_v38 = vand.u32 1, %v655_v32 }
 0x10e   :  { %v641_v39 = vsel %vm638_vm11, %v639_v20, %v640_v21  ;;  %v644_v48 = vsel %vm638_vm11, %v642_v4, %v643_v33  ;;  %v646_v6 = vsel %vm638_vm11, %v645_v29, %v636_v63  ;;  %v649_v51 = vsel %vm638_vm11, %v647_v31, %v648_v37 }
 0x10f   :  { %vm652_vm12 = vcmp.eq.s32.totalorder %v651_v30, 1  ;;  %vm657_vm13 = vcmp.eq.s32.totalorder %v656_v38, 1  ;;  %v708_v20 = vrot.slane %v705_v62, 5  ;;  %v709_v21 = vrot.slane %v705_v62, 4 }
 0x110   :  { %v653_v9 = vsel %vm652_vm12, %v644_v48, %v641_v39  ;;  %v654_v10 = vsel %vm652_vm12, %v649_v51, %v646_v6  ;;  %v711_v4 = vrot.slane %v705_v62, 7  ;;  %v712_v33 = vrot.slane %v705_v62, 6 }
 0x111   :  { %v1116_v11 = vsel %vm657_vm13, %v654_v10, %v653_v9  ;;  %v714_v29 = vrot.slane %v705_v62, 1  ;;  %v716_v31 = vrot.slane %v705_v62, 3  ;;  %v717_v37 = vrot.slane %v705_v62, 2 }
 0x112   :  { %v660_v14 = vand.u32 1, %v1116_v11  ;;  %v673_v17 = vshra.s32 %v1116_v11, 1  ;;  %v678_v24 = vshra.s32 %v1116_v11, 2 }
 0x114   :  { %vm661_vm14 = vcmp.eq.s32.totalorder %v660_v14, 1  ;;  %v674_v34 = vand.u32 1, %v673_v17  ;;  %v679_v35 = vand.u32 1, %v678_v24 }
 0x115   :  { %v664_v36 = vsel %vm661_vm14, %v662_v12, %v663_v13  ;;  %v667_v40 = vsel %vm661_vm14, %v665_v15, %v666_v25  ;;  %v669_v41 = vsel %vm661_vm14, %v668_v26, %v659_v8  ;;  %v672_v42 = vsel %vm661_vm14, %v670_v27, %v671_v28  ;;  %v728_v8 = vld [vmem:[#allocation2 + $0x10] sm:$0xff] }
 0x116   :  { %vm675_vm15 = vcmp.eq.s32.totalorder %v674_v34, 1  ;;  %vm680_vm1 = vcmp.eq.s32.totalorder %v679_v35, 1  ;;  %v731_v13 = vrot.slane %v728_v8, 5  ;;  %v732_v14 = vrot.slane %v728_v8, 4 }
 0x117   :  { %v676_v44 = vsel %vm675_vm15, %v667_v40, %v664_v36  ;;  %v677_v45 = vsel %vm675_vm15, %v672_v42, %v669_v41  ;;  %v734_v17 = vrot.slane %v728_v8, 7  ;;  %v735_v26 = vrot.slane %v728_v8, 6 }
 0x118   :  { %v1121_v46 = vsel %vm680_vm1, %v677_v45, %v676_v44  ;;  %v737_v27 = vrot.slane %v728_v8, 1  ;;  %v739_v28 = vrot.slane %v728_v8, 3  ;;  %v740_v34 = vrot.slane %v728_v8, 2  ;;  %v751_v44 = vld [vmem:[#allocation2 + $0x8] sm:$0xff] }
 0x119   :  { %v683_v47 = vand.u32 1, %v1121_v46  ;;  %v696_v49 = vshra.s32 %v1121_v46, 1  ;;  %v701_v50 = vshra.s32 %v1121_v46, 2  ;;  %vm774_vm14 = vcmp.eq.s32.totalorder %v887_v16, 0 }
 0x11a   :  { %vm780_vm15 = vcmp.eq.s32.totalorder %v887_v16, 1  ;;  %vm786_vm1 = vcmp.eq.s32.totalorder %v887_v16, 2 }
 0x11b   :  { %vm684_vm2 = vcmp.eq.s32.totalorder %v683_v47, 1  ;;  %v697_v56 = vand.u32 1, %v696_v49  ;;  %v702_v57 = vand.u32 1, %v701_v50  ;;  %v754_v47 = vrot.slane %v751_v44, 5 }
 0x11c   :  { %v687_v58 = vsel %vm684_vm2, %v685_v1, %v686_v5  ;;  %v690_v59 = vsel %vm684_vm2, %v688_v7, %v689_v52  ;;  %v692_v60 = vsel %vm684_vm2, %v691_v53, %v682_v43  ;;  %v695_v61 = vsel %vm684_vm2, %v693_v54, %v694_v55 }
 0x11d   :  { %vm698_vm3 = vcmp.eq.s32.totalorder %v697_v56, 1  ;;  %vm703_vm4 = vcmp.eq.s32.totalorder %v702_v57, 1  ;;  %v755_v7 = vrot.slane %v751_v44, 4  ;;  %v757_v50 = vrot.slane %v751_v44, 7 }
 0x11e   :  { %v699_v63 = vsel %vm698_vm3, %v690_v59, %v687_v58  ;;  %v700_v2 = vsel %vm698_vm3, %v695_v61, %v692_v60  ;;  %v758_v54 = vrot.slane %v751_v44, 6  ;;  %v760_v55 = vrot.slane %v751_v44, 1 }
 0x11f   :  { %v1126_v3 = vsel %vm703_vm4, %v700_v2, %v699_v63  ;;  %v762_v56 = vrot.slane %v751_v44, 3  ;;  %v763_v57 = vrot.slane %v751_v44, 2  ;;  %vm792_vm2 = vcmp.eq.s32.totalorder %v887_v16, 3 }
 0x120   :  { %v706_v19 = vand.u32 1, %v1126_v3  ;;  %v719_v23 = vshra.s32 %v1126_v3, 1  ;;  %v724_v32 = vshra.s32 %v1126_v3, 2  ;;  %vm798_vm3 = vcmp.eq.s32.totalorder %v887_v16, 4 }
 0x121   :  { %vm804_vm4 = vcmp.eq.s32.totalorder %v887_v16, 5 }
 0x122   :  { %vm707_vm5 = vcmp.eq.s32.totalorder %v706_v19, 1  ;;  %v720_v30 = vand.u32 1, %v719_v23  ;;  %v725_v38 = vand.u32 1, %v724_v32 }
 0x123   :  { %v710_v39 = vsel %vm707_vm5, %v708_v20, %v709_v21  ;;  %v713_v48 = vsel %vm707_vm5, %v711_v4, %v712_v33  ;;  %v715_v6 = vsel %vm707_vm5, %v714_v29, %v705_v62  ;;  %v718_v51 = vsel %vm707_vm5, %v716_v31, %v717_v37 }
 0x124   :  { %vm721_vm6 = vcmp.eq.s32.totalorder %v720_v30, 1  ;;  %vm726_vm7 = vcmp.eq.s32.totalorder %v725_v38, 1  ;;  %v796_v29 = vrot.slane %v1126_v3, %v903_v22  ;;  %v802_v37 = vrot.slane %v1121_v46, %v903_v22 }
 0x125   :  { %v722_v9 = vsel %vm721_vm6, %v713_v48, %v710_v39  ;;  %v723_v10 = vsel %vm721_vm6, %v718_v51, %v715_v6  ;;  %vm810_vm5 = vcmp.eq.s32.totalorder %v887_v16, 6  ;;  %v808_v38 = vrot.slane %v1116_v11, %v903_v22 }
 0x126   :  { %v727_v12 = vsel %vm726_vm7, %v723_v10, %v722_v9  ;;  %vm816_vm6 = vcmp.eq.s32.totalorder %v887_v16, 7  ;;  %v814_v48 = vrot.slane %v1111_v18, %v903_v22  ;;  %v820_v3 = vrot.slane %v1106_v0, %v903_v22 }
 0x127   :  { %v729_v15 = vand.u32 1, %v727_v12  ;;  %v742_v24 = vshra.s32 %v727_v12, 1  ;;  %v747_v25 = vshra.s32 %v727_v12, 2  ;;  %v790_v32 = vrot.slane %v727_v12, %v903_v22 }
 0x129   :  { %vm730_vm8 = vcmp.eq.s32.totalorder %v729_v15, 1  ;;  %v743_v35 = vand.u32 1, %v742_v24  ;;  %v748_v36 = vand.u32 1, %v747_v25 }
 0x12a   :  { %v733_v40 = vsel %vm730_vm8, %v731_v13, %v732_v14  ;;  %v736_v41 = vsel %vm730_vm8, %v734_v17, %v735_v26  ;;  %v738_v42 = vsel %vm730_vm8, %v737_v27, %v728_v8  ;;  %v741_v43 = vsel %vm730_vm8, %v739_v28, %v740_v34 }
 0x12b   :  { %vm744_vm9 = vcmp.eq.s32.totalorder %v743_v35, 1  ;;  %vm749_vm10 = vcmp.eq.s32.totalorder %v748_v36, 1 }
 0x12c   :  { %v745_v45 = vsel %vm744_vm9, %v736_v41, %v733_v40  ;;  %v746_v1 = vsel %vm744_vm9, %v741_v43, %v738_v42 }
 0x12d   :  { %v750_v5 = vsel %vm749_vm10, %v746_v1, %v745_v45 }
 0x12e   :  { %v752_v49 = vand.u32 1, %v750_v5  ;;  %v765_v52 = vshra.s32 %v750_v5, 1  ;;  %v770_v53 = vshra.s32 %v750_v5, 2  ;;  %v784_v4 = vrot.slane %v750_v5, %v903_v22 }
 0x130   :  { %vm753_vm11 = vcmp.eq.s32.totalorder %v752_v49, 1  ;;  %v766_v58 = vand.u32 1, %v765_v52  ;;  %v771_v59 = vand.u32 1, %v770_v53 }
 0x131   :  { %v756_v60 = vsel %vm753_vm11, %v754_v47, %v755_v7  ;;  %v759_v61 = vsel %vm753_vm11, %v757_v50, %v758_v54  ;;  %v761_v62 = vsel %vm753_vm11, %v760_v55, %v751_v44  ;;  %v764_v63 = vsel %vm753_vm11, %v762_v56, %v763_v57 }
 0x132   :  { %vm767_vm12 = vcmp.eq.s32.totalorder %v766_v58, 1  ;;  %vm772_vm13 = vcmp.eq.s32.totalorder %v771_v59, 1 }
 0x133   :  { %v768_v2 = vsel %vm767_vm12, %v759_v61, %v756_v60  ;;  %v769_v20 = vsel %vm767_vm12, %v764_v63, %v761_v62 }
 0x134   :  { %v773_v21 = vsel %vm772_vm13, %v769_v20, %v768_v2 }
 0x135   :  { %v778_v19 = vrot.slane %v773_v21, %v903_v22 }
 0x137   :  { %v779_v23 = vsel %vm774_vm14, %v778_v19, 0 }
 0x138   :  { %v785_v33 = vsel %vm780_vm15, %v784_v4, %v779_v23 }
 0x139   :  { %v791_v31 = vsel %vm786_vm1, %v790_v32, %v785_v33 }
 0x13a   :  { %v797_v30 = vsel %vm792_vm2, %v796_v29, %v791_v31 }
 0x13b   :  { %v803_v39 = vsel %vm798_vm3, %v802_v37, %v797_v30 }
 0x13c   :  { %v809_v6 = vsel %vm804_vm4, %v808_v38, %v803_v39 }
 0x13d   :  { %v815_v51 = vsel %vm810_vm5, %v814_v48, %v809_v6 }
 0x13e   :  { %v821_v8 = vsel %vm816_vm6, %v820_v3, %v815_v51 }
 0x13f   :  { %822 = vst.msk [vmem:[%s1158_s2] sm:$0xff] %vm17_vm0, %v821_v8 }

</bundles_post_ra>
